<compile_context>
chip_gen: v7x
topology: tpu7x:2x2x1
jax: 0.10.0
libtpu: 0.0.40
codegen_flags: <defaults>
</compile_context>

<pallas_src>
import functools

import jax
import jax.numpy as jnp
from jax import lax
from jax.experimental import pallas as pl
from jax.experimental.pallas import tpu as pltpu


LANE = 128      # channel padding target (lane width)
SUBLANE = 8     # length / batch padding target (sublane count)


def _round_up(x, m):
    return (x + m - 1) // m * m


def _make_stack_cnn_kernel(layer_num, kernel_size, l_pad, l_final, use_bf16):
    """Fused StackCNN kernel for fixed layer count / kernel size / lengths."""

    def kernel(x_ref, *refs):
        out_ref = refs[-1]
        param_refs = refs[:-1]

        x = x_ref[...]                                   # (tn, C_in, L) f32
        tn, c_in, l_in = x.shape

        # NCL -> NLC inside the kernel (tiny XLU transpose on the block;
        # avoids an extra HBM round trip of x in the wrapper).
        h = jnp.transpose(x, (0, 2, 1))                  # (tn, L, C_in)
        if l_pad > l_in:
            # Pad length to a sublane multiple so the flatten below is free.
            h = jnp.concatenate(
                [h, jnp.zeros((tn, l_pad - l_in, c_in), h.dtype)], axis=1)

        rows = tn * l_pad
        h2 = h.reshape(rows, c_in)                       # free (l_pad % 8 == 0)

        for li in range(layer_num):
            w = param_refs[2 * li][...]                  # (K, C_in_l, C_pad)
            b = param_refs[2 * li + 1][...]              # (1, C_pad)

            # Tap-k operand: rows shifted forward by k.  Rows that wrap across
            # batch elements (or into zero length-padding) only feed output
            # positions that are outside the valid window and get masked later.
            taps = [h2] + [
                pltpu.roll(h2, shift=rows - k, axis=0)   # out[m] = h2[(m+k) % rows]
                for k in range(1, kernel_size)
            ]
            if use_bf16:
                taps = [t.astype(jnp.bfloat16) for t in taps]
                w = w.astype(jnp.bfloat16)

            # K accumulating MXU matmuls, f32 accumulation.
            acc = jnp.dot(taps[0], w[0], preferred_element_type=jnp.float32)
            for k in range(1, kernel_size):
                acc = acc + jnp.dot(taps[k], w[k],
                                    preferred_element_type=jnp.float32)

            # Lane-dense bias + ReLU on the VPU (C_pad multiple of 128), f32.
            h2 = jnp.maximum(acc + b, 0.0)               # (rows, C_pad)

        # Fused AdaptiveMaxPool1d(1): mask invalid length positions and take a
        # sublane max.  ReLU guarantees values >= 0, so masking invalid
        # positions to 0 leaves the max over the valid window unchanged.
        c_pad = h2.shape[-1]
        h3 = h2.reshape(tn, l_pad, c_pad)                # free relayout
        pos = lax.broadcasted_iota(jnp.int32, (1, l_pad, 1), 1)
        masked = jnp.where(pos < l_final, h3, 0.0)
        out_ref[...] = jnp.max(masked, axis=1).astype(out_ref.dtype)

    return kernel


def _pick_batch_tile(n, l_pad, c_pad, act_budget_bytes=4 << 20):
    """Batch tile: large enough that M = tn*l_pad keeps the MXU out of
    latency-dominated territory and per-step overhead is amortized, small
    enough that a few (tn*l_pad, c_pad) f32 slabs fit VMEM on every generation
    (including v7x's 64 MiB)."""
    per_batch_row = l_pad * c_pad * 4
    tn = max(SUBLANE, (act_budget_bytes // per_batch_row) // SUBLANE * SUBLANE)
    return min(tn, _round_up(n, SUBLANE))


@functools.partial(
    jax.jit,
    static_argnames=("layer_num", "kernel_size", "out_channels", "use_bf16"))
def stack_cnn_forward(x, params_flat, *, layer_num, kernel_size, out_channels,
                      use_bf16=False):
    """x: (N, C_in, L) f32 (PyTorch NCL). params_flat from pack_params().
    Returns (N, out_channels) f32."""
    n, c_in, length = x.shape
    c_pad = params_flat[0].shape[-1]

    l_final = length - layer_num * (kernel_size - 1)
    assert l_final >= 1, "sequence too short for StackCNN"
    l_pad = _round_up(length, SUBLANE)

    tn = _pick_batch_tile(n, l_pad, c_pad)
    n_pad = _round_up(n, tn)
    if n_pad != n:
        x = jnp.pad(x, ((0, n_pad - n), (0, 0), (0, 0)))
    grid = (n_pad // tn,)

    in_specs = [pl.BlockSpec((tn, c_in, length), lambda i: (i, 0, 0))]
    for li in range(layer_num):
        w = params_flat[2 * li]
        b = params_flat[2 * li + 1]
        in_specs.append(pl.BlockSpec(w.shape, lambda i: (0, 0, 0)))
        in_specs.append(pl.BlockSpec(b.shape, lambda i: (0, 0)))
    out_specs = pl.BlockSpec((tn, c_pad), lambda i: (i, 0))

    # Advisory cost estimate so XLA can schedule surrounding ops.
    flops = 0
    c_prev = c_in
    for li in range(layer_num):
        c_out_l = params_flat[2 * li].shape[-1]
        flops += 2 * n_pad * l_pad * kernel_size * c_prev * c_out_l
        c_prev = c_out_l
    bytes_accessed = (x.size * 4 + sum(int(p.size) * 4 for p in params_flat)
                      + n_pad * c_pad * 4)

    kernel = _make_stack_cnn_kernel(layer_num, kernel_size, l_pad, l_final,
                                    use_bf16)

    out = pl.pallas_call(
        kernel,
        out_shape=jax.ShapeDtypeStruct((n_pad, c_pad), jnp.float32),
        grid=grid,
        in_specs=in_specs,
        out_specs=out_specs,
        compiler_params=pltpu.CompilerParams(
            dimension_semantics=("parallel",),
            vmem_limit_bytes=48 * 1024 * 1024),
        cost_estimate=pl.CostEstimate(
            flops=int(flops), transcendentals=0,
            bytes_accessed=int(bytes_accessed)),
    )(x, *params_flat)

    # Strip batch padding and zero-padded channels.
    return out[:n, :out_channels]


def init_params(key, layer_num, in_channels, out_channels, kernel_size):
    """Deterministic PyTorch-like (kaiming-uniform-ish) Conv1d init."""
    params = []
    c_in = in_channels
    for _ in range(layer_num):
        key, kw, kb = jax.random.split(key, 3)
        fan_in = c_in * kernel_size
        bound = 1.0 / jnp.sqrt(fan_in)
        w = jax.random.uniform(
            kw, (out_channels, c_in, kernel_size), jnp.float32, -bound, bound)
        b = jax.random.uniform(kb, (out_channels,), jnp.float32, -bound, bound)
        params.append((w, b))
        c_in = out_channels
    return params


def pack_params(params, lane_pad=LANE):
    """Host-side packing: Conv1d weight (C_out, C_in, K) -> (K, C_in_l, C_pad),
    tap-major, zero-padded to 128 output lanes (interior layers also pad C_in);
    bias -> (1, C_pad) zero-padded.  Zero pad weights/biases keep padded
    channels identically 0 so the wrapper can slice them off."""
    flat = []
    for li, (w, b) in enumerate(params):
        c_out, c_in, k = w.shape
        c_out_pad = _round_up(c_out, lane_pad)
        c_in_pad = c_in if li == 0 else _round_up(c_in, lane_pad)
        wt = jnp.transpose(w, (2, 1, 0))                 # (K, C_in, C_out)
        wp = jnp.zeros((k, c_in_pad, c_out_pad), jnp.float32)
        wp = wp.at[:, :c_in, :c_out].set(wt)
        bp = jnp.zeros((1, c_out_pad), jnp.float32).at[0, :c_out].set(b)
        flat.extend([wp, bp])
    return tuple(flat)


def ref_forward(x, params):
    """Pure-JAX reference mirroring PyTorch semantics (cross-correlation)."""
    h = x
    for w, b in params:
        c_out, _, k_sz = w.shape
        l_out = h.shape[-1] - k_sz + 1
        acc = jnp.zeros((h.shape[0], c_out, l_out), jnp.float32)
        for k in range(k_sz):
            acc = acc + jnp.einsum("oc,ncl->nol", w[:, :, k], h[:, :, k:k + l_out])
        h = jnp.maximum(acc + b[None, :, None], 0.0)
    return jnp.max(h, axis=-1)  # AdaptiveMaxPool1d(1) + squeeze(-1)


if __name__ == "__main__":
    # StackCNN(layer_num=3, in_channels=4, out_channels=32, kernel_size=3)
    layer_num, in_channels, out_channels, kernel_size = 3, 4, 32, 3
    batch, seq = 2, 16

    key = jax.random.PRNGKey(0)
    key, kx = jax.random.split(key)
    x = jax.random.normal(kx, (batch, in_channels, seq), jnp.float32)

    params = init_params(key, layer_num, in_channels, out_channels, kernel_size)
    params_flat = pack_params(params)

    out = stack_cnn_forward(
        x, params_flat, layer_num=layer_num, kernel_size=kernel_size,
        out_channels=out_channels)
    out = jax.block_until_ready(out)

    ref = ref_forward(x, params)
    assert out.shape == (batch, out_channels), out.shape
    assert jnp.allclose(out, ref, atol=1e-5, rtol=1e-5), "mismatch vs reference"

    print("KERNEL_OK")
</pallas_src>

<mosaic_0001>
module attributes {stable_mosaic.version = 11 : i64} {
  func.func @kernel(%arg0: i32, %arg1: memref<8x4x16xf32, #tpu.memory_space<vmem>>, %arg2: memref<3x4x128xf32, #tpu.memory_space<vmem>>, %arg3: memref<1x128xf32, #tpu.memory_space<vmem>>, %arg4: memref<3x128x128xf32, #tpu.memory_space<vmem>>, %arg5: memref<1x128xf32, #tpu.memory_space<vmem>>, %arg6: memref<3x128x128xf32, #tpu.memory_space<vmem>>, %arg7: memref<1x128xf32, #tpu.memory_space<vmem>>, %arg8: memref<8x128xf32, #tpu.memory_space<vmem>>) attributes {dimension_semantics = [#tpu.dimension_semantics<parallel>], iteration_bounds = array<i64: 1>, scalar_prefetch = 0 : i64, scratch_operands = 0 : i64, tpu.core_type = #tpu.core_type<tc>, window_params = [{transform_indices = @transform_0, window_bounds = array<i64: 8, 4, 16>}, {pipeline_mode = #tpu.pipeline_mode<synchronous>, transform_indices = @transform_1, window_bounds = array<i64: 3, 4, 128>}, {pipeline_mode = #tpu.pipeline_mode<synchronous>, transform_indices = @transform_2, window_bounds = array<i64: 1, 128>}, {pipeline_mode = #tpu.pipeline_mode<synchronous>, transform_indices = @transform_3, window_bounds = array<i64: 3, 128, 128>}, {pipeline_mode = #tpu.pipeline_mode<synchronous>, transform_indices = @transform_4, window_bounds = array<i64: 1, 128>}, {pipeline_mode = #tpu.pipeline_mode<synchronous>, transform_indices = @transform_5, window_bounds = array<i64: 3, 128, 128>}, {pipeline_mode = #tpu.pipeline_mode<synchronous>, transform_indices = @transform_6, window_bounds = array<i64: 1, 128>}, {transform_indices = @transform_7, window_bounds = array<i64: 8, 128>}]} {
    %c0 = arith.constant 0 : index
    %c0_0 = arith.constant 0 : index
    %c0_1 = arith.constant 0 : index
    %0 = vector.load %arg1[%c0, %c0_0, %c0_1] : memref<8x4x16xf32, #tpu.memory_space<vmem>>, vector<8x4x16xf32>
    %1 = tpu.transpose %0, [0, 2, 1] : vector<8x4x16xf32> -> vector<8x16x4xf32>
    %2 = vector.shape_cast %1 : vector<8x16x4xf32> to vector<128x4xf32>
    %c0_2 = arith.constant 0 : index
    %c0_3 = arith.constant 0 : index
    %c0_4 = arith.constant 0 : index
    %3 = vector.load %arg2[%c0_2, %c0_3, %c0_4] : memref<3x4x128xf32, #tpu.memory_space<vmem>>, vector<3x4x128xf32>
    %c0_5 = arith.constant 0 : index
    %c0_6 = arith.constant 0 : index
    %4 = vector.load %arg3[%c0_5, %c0_6] : memref<1x128xf32, #tpu.memory_space<vmem>>, vector<1x128xf32>
    %c127_i32 = arith.constant 127 : i32
    %5 = tpu.dynamic_rotate %2 by %c127_i32 dim 0 : vector<128x4xf32>, i32 -> vector<128x4xf32>
    %c126_i32 = arith.constant 126 : i32
    %6 = tpu.dynamic_rotate %2 by %c126_i32 dim 0 : vector<128x4xf32>, i32 -> vector<128x4xf32>
    %7 = vector.extract_strided_slice %3 {offsets = [0, 0, 0], sizes = [1, 4, 128], strides = [1, 1, 1]} : vector<3x4x128xf32> to vector<1x4x128xf32>
    %8 = vector.shape_cast %7 : vector<1x4x128xf32> to vector<4x128xf32>
    %cst = arith.constant dense<0.000000e+00> : vector<128x128xf32>
    %9 = tpu.matmul %2, %8, %cst {dimension_numbers = #tpu.dot_dimension_numbers<[1], [0], [0], [1], [0, 0, 1, 1], [], []>} : vector<128x4xf32>, vector<4x128xf32>, vector<128x128xf32> -> vector<128x128xf32>
    %10 = vector.extract_strided_slice %3 {offsets = [1, 0, 0], sizes = [1, 4, 128], strides = [1, 1, 1]} : vector<3x4x128xf32> to vector<1x4x128xf32>
    %11 = vector.shape_cast %10 : vector<1x4x128xf32> to vector<4x128xf32>
    %cst_7 = arith.constant dense<0.000000e+00> : vector<128x128xf32>
    %12 = tpu.matmul %5, %11, %cst_7 {dimension_numbers = #tpu.dot_dimension_numbers<[1], [0], [0], [1], [0, 0, 1, 1], [], []>} : vector<128x4xf32>, vector<4x128xf32>, vector<128x128xf32> -> vector<128x128xf32>
    %13 = arith.addf %9, %12 : vector<128x128xf32>
    %14 = vector.extract_strided_slice %3 {offsets = [2, 0, 0], sizes = [1, 4, 128], strides = [1, 1, 1]} : vector<3x4x128xf32> to vector<1x4x128xf32>
    %15 = vector.shape_cast %14 : vector<1x4x128xf32> to vector<4x128xf32>
    %cst_8 = arith.constant dense<0.000000e+00> : vector<128x128xf32>
    %16 = tpu.matmul %6, %15, %cst_8 {dimension_numbers = #tpu.dot_dimension_numbers<[1], [0], [0], [1], [0, 0, 1, 1], [], []>} : vector<128x4xf32>, vector<4x128xf32>, vector<128x128xf32> -> vector<128x128xf32>
    %17 = arith.addf %13, %16 : vector<128x128xf32>
    %18 = vector.broadcast %4 : vector<1x128xf32> to vector<128x128xf32>
    %19 = arith.addf %17, %18 : vector<128x128xf32>
    %cst_9 = arith.constant 0.000000e+00 : f32
    %20 = vector.broadcast %cst_9 : f32 to vector<128x128xf32>
    %21 = arith.maximumf %19, %20 : vector<128x128xf32>
    %c0_10 = arith.constant 0 : index
    %c0_11 = arith.constant 0 : index
    %c0_12 = arith.constant 0 : index
    %22 = vector.load %arg4[%c0_10, %c0_11, %c0_12] : memref<3x128x128xf32, #tpu.memory_space<vmem>>, vector<3x128x128xf32>
    %c0_13 = arith.constant 0 : index
    %c0_14 = arith.constant 0 : index
    %23 = vector.load %arg5[%c0_13, %c0_14] : memref<1x128xf32, #tpu.memory_space<vmem>>, vector<1x128xf32>
    %c127_i32_15 = arith.constant 127 : i32
    %24 = tpu.dynamic_rotate %21 by %c127_i32_15 dim 0 : vector<128x128xf32>, i32 -> vector<128x128xf32>
    %c126_i32_16 = arith.constant 126 : i32
    %25 = tpu.dynamic_rotate %21 by %c126_i32_16 dim 0 : vector<128x128xf32>, i32 -> vector<128x128xf32>
    %26 = vector.extract_strided_slice %22 {offsets = [0, 0, 0], sizes = [1, 128, 128], strides = [1, 1, 1]} : vector<3x128x128xf32> to vector<1x128x128xf32>
    %27 = vector.shape_cast %26 : vector<1x128x128xf32> to vector<128x128xf32>
    %cst_17 = arith.constant dense<0.000000e+00> : vector<128x128xf32>
    %28 = tpu.matmul %21, %27, %cst_17 {dimension_numbers = #tpu.dot_dimension_numbers<[1], [0], [0], [1], [0, 0, 1, 1], [], []>} : vector<128x128xf32>, vector<128x128xf32>, vector<128x128xf32> -> vector<128x128xf32>
    %29 = vector.extract_strided_slice %22 {offsets = [1, 0, 0], sizes = [1, 128, 128], strides = [1, 1, 1]} : vector<3x128x128xf32> to vector<1x128x128xf32>
    %30 = vector.shape_cast %29 : vector<1x128x128xf32> to vector<128x128xf32>
    %cst_18 = arith.constant dense<0.000000e+00> : vector<128x128xf32>
    %31 = tpu.matmul %24, %30, %cst_18 {dimension_numbers = #tpu.dot_dimension_numbers<[1], [0], [0], [1], [0, 0, 1, 1], [], []>} : vector<128x128xf32>, vector<128x128xf32>, vector<128x128xf32> -> vector<128x128xf32>
    %32 = arith.addf %28, %31 : vector<128x128xf32>
    %33 = vector.extract_strided_slice %22 {offsets = [2, 0, 0], sizes = [1, 128, 128], strides = [1, 1, 1]} : vector<3x128x128xf32> to vector<1x128x128xf32>
    %34 = vector.shape_cast %33 : vector<1x128x128xf32> to vector<128x128xf32>
    %cst_19 = arith.constant dense<0.000000e+00> : vector<128x128xf32>
    %35 = tpu.matmul %25, %34, %cst_19 {dimension_numbers = #tpu.dot_dimension_numbers<[1], [0], [0], [1], [0, 0, 1, 1], [], []>} : vector<128x128xf32>, vector<128x128xf32>, vector<128x128xf32> -> vector<128x128xf32>
    %36 = arith.addf %32, %35 : vector<128x128xf32>
    %37 = vector.broadcast %23 : vector<1x128xf32> to vector<128x128xf32>
    %38 = arith.addf %36, %37 : vector<128x128xf32>
    %cst_20 = arith.constant 0.000000e+00 : f32
    %39 = vector.broadcast %cst_20 : f32 to vector<128x128xf32>
    %40 = arith.maximumf %38, %39 : vector<128x128xf32>
    %c0_21 = arith.constant 0 : index
    %c0_22 = arith.constant 0 : index
    %c0_23 = arith.constant 0 : index
    %41 = vector.load %arg6[%c0_21, %c0_22, %c0_23] : memref<3x128x128xf32, #tpu.memory_space<vmem>>, vector<3x128x128xf32>
    %c0_24 = arith.constant 0 : index
    %c0_25 = arith.constant 0 : index
    %42 = vector.load %arg7[%c0_24, %c0_25] : memref<1x128xf32, #tpu.memory_space<vmem>>, vector<1x128xf32>
    %c127_i32_26 = arith.constant 127 : i32
    %43 = tpu.dynamic_rotate %40 by %c127_i32_26 dim 0 : vector<128x128xf32>, i32 -> vector<128x128xf32>
    %c126_i32_27 = arith.constant 126 : i32
    %44 = tpu.dynamic_rotate %40 by %c126_i32_27 dim 0 : vector<128x128xf32>, i32 -> vector<128x128xf32>
    %45 = vector.extract_strided_slice %41 {offsets = [0, 0, 0], sizes = [1, 128, 128], strides = [1, 1, 1]} : vector<3x128x128xf32> to vector<1x128x128xf32>
    %46 = vector.shape_cast %45 : vector<1x128x128xf32> to vector<128x128xf32>
    %cst_28 = arith.constant dense<0.000000e+00> : vector<128x128xf32>
    %47 = tpu.matmul %40, %46, %cst_28 {dimension_numbers = #tpu.dot_dimension_numbers<[1], [0], [0], [1], [0, 0, 1, 1], [], []>} : vector<128x128xf32>, vector<128x128xf32>, vector<128x128xf32> -> vector<128x128xf32>
    %48 = vector.extract_strided_slice %41 {offsets = [1, 0, 0], sizes = [1, 128, 128], strides = [1, 1, 1]} : vector<3x128x128xf32> to vector<1x128x128xf32>
    %49 = vector.shape_cast %48 : vector<1x128x128xf32> to vector<128x128xf32>
    %cst_29 = arith.constant dense<0.000000e+00> : vector<128x128xf32>
    %50 = tpu.matmul %43, %49, %cst_29 {dimension_numbers = #tpu.dot_dimension_numbers<[1], [0], [0], [1], [0, 0, 1, 1], [], []>} : vector<128x128xf32>, vector<128x128xf32>, vector<128x128xf32> -> vector<128x128xf32>
    %51 = arith.addf %47, %50 : vector<128x128xf32>
    %52 = vector.extract_strided_slice %41 {offsets = [2, 0, 0], sizes = [1, 128, 128], strides = [1, 1, 1]} : vector<3x128x128xf32> to vector<1x128x128xf32>
    %53 = vector.shape_cast %52 : vector<1x128x128xf32> to vector<128x128xf32>
    %cst_30 = arith.constant dense<0.000000e+00> : vector<128x128xf32>
    %54 = tpu.matmul %44, %53, %cst_30 {dimension_numbers = #tpu.dot_dimension_numbers<[1], [0], [0], [1], [0, 0, 1, 1], [], []>} : vector<128x128xf32>, vector<128x128xf32>, vector<128x128xf32> -> vector<128x128xf32>
    %55 = arith.addf %51, %54 : vector<128x128xf32>
    %56 = vector.broadcast %42 : vector<1x128xf32> to vector<128x128xf32>
    %57 = arith.addf %55, %56 : vector<128x128xf32>
    %cst_31 = arith.constant 0.000000e+00 : f32
    %58 = vector.broadcast %cst_31 : f32 to vector<128x128xf32>
    %59 = arith.maximumf %57, %58 : vector<128x128xf32>
    %60 = vector.shape_cast %59 : vector<128x128xf32> to vector<8x16x128xf32>
    %61 = tpu.iota {dimensions = array<i32: 1>} : vector<1x16x1xi32>
    %c10_i32 = arith.constant 10 : i32
    %62 = vector.broadcast %c10_i32 : i32 to vector<1x16x1xi32>
    %63 = arith.cmpi slt, %61, %62 : vector<1x16x1xi32>
    %cst_32 = arith.constant 0.000000e+00 : f32
    %64 = vector.shape_cast %63 : vector<1x16x1xi1> to vector<1x16x1xi1>
    %65 = vector.broadcast %64 : vector<1x16x1xi1> to vector<8x16x128xi1>
    %66 = vector.broadcast %cst_32 : f32 to vector<8x16x128xf32>
    %67 = arith.select %65, %60, %66 : vector<8x16x128xi1>, vector<8x16x128xf32>
    %cst_33 = arith.constant dense<0xFF800000> : vector<8x128xf32>
    %68 = vector.multi_reduction <maximumf>, %67, %cst_33 [1] : vector<8x16x128xf32> to vector<8x128xf32>
    %c0_34 = arith.constant 0 : index
    %c0_35 = arith.constant 0 : index
    %69 = vector.load %arg8[%c0_34, %c0_35] : memref<8x128xf32, #tpu.memory_space<vmem>>, vector<8x128xf32>
    tpu.vector_store %arg8[%c0_34, %c0_35], %68 {strides = array<i32>} : memref<8x128xf32, #tpu.memory_space<vmem>>, vector<8x128xf32>,
    return
  }
  func.func @transform_0(%arg0: i32) -> (i32, i32, i32) {
    %c0_i32 = arith.constant 0 : i32
    %c0_i32_0 = arith.constant 0 : i32
    %c0_i32_1 = arith.constant 0 : i32
    return %arg0, %c0_i32, %c0_i32_0 : i32, i32, i32
  }
  func.func @transform_1(%arg0: i32) -> (i32, i32, i32) {
    %c0_i32 = arith.constant 0 : i32
    %c0_i32_0 = arith.constant 0 : i32
    %c0_i32_1 = arith.constant 0 : i32
    %c0_i32_2 = arith.constant 0 : i32
    return %c0_i32, %c0_i32_0, %c0_i32_1 : i32, i32, i32
  }
  func.func @transform_2(%arg0: i32) -> (i32, i32) {
    %c0_i32 = arith.constant 0 : i32
    %c0_i32_0 = arith.constant 0 : i32
    %c0_i32_1 = arith.constant 0 : i32
    return %c0_i32, %c0_i32_0 : i32, i32
  }
  func.func @transform_3(%arg0: i32) -> (i32, i32, i32) {
    %c0_i32 = arith.constant 0 : i32
    %c0_i32_0 = arith.constant 0 : i32
    %c0_i32_1 = arith.constant 0 : i32
    %c0_i32_2 = arith.constant 0 : i32
    return %c0_i32, %c0_i32_0, %c0_i32_1 : i32, i32, i32
  }
  func.func @transform_4(%arg0: i32) -> (i32, i32) {
    %c0_i32 = arith.constant 0 : i32
    %c0_i32_0 = arith.constant 0 : i32
    %c0_i32_1 = arith.constant 0 : i32
    return %c0_i32, %c0_i32_0 : i32, i32
  }
  func.func @transform_5(%arg0: i32) -> (i32, i32, i32) {
    %c0_i32 = arith.constant 0 : i32
    %c0_i32_0 = arith.constant 0 : i32
    %c0_i32_1 = arith.constant 0 : i32
    %c0_i32_2 = arith.constant 0 : i32
    return %c0_i32, %c0_i32_0, %c0_i32_1 : i32, i32, i32
  }
  func.func @transform_6(%arg0: i32) -> (i32, i32) {
    %c0_i32 = arith.constant 0 : i32
    %c0_i32_0 = arith.constant 0 : i32
    %c0_i32_1 = arith.constant 0 : i32
    return %c0_i32, %c0_i32_0 : i32, i32
  }
  func.func @transform_7(%arg0: i32) -> (i32, i32) {
    %c0_i32 = arith.constant 0 : i32
    %c0_i32_0 = arith.constant 0 : i32
    return %arg0, %c0_i32 : i32, i32
  }
}

</mosaic_0001>

<bundles_post_ra>
// kernel: stack_cnn_forward.1
= control target key start
LH: loop header
LB: loop body
LE: loop exit
PB: predicated region body
PF: predicated region fallthrough
CT: control target
= control target key end

     0   :  { %12 = vsyncpa [#allocation3], 0  ;;  %s4269_s0 = inlined_call_operand.vmem [shape: f32[8,4,16], index: 0, kind: input, shape index: {}]   ;;  %s4270_s1 = inlined_call_operand.vmem [shape: f32[3,4,128], index: 1, kind: input, shape index: {}]   ;;  %s4271_s2 = inlined_call_operand.vmem [shape: f32[1,128], index: 2, kind: input, shape index: {}]   ;;  %s4272_s3 = inlined_call_operand.hbm [shape: f32[3,128,128], index: 3, kind: input, shape index: {}]   ;;  %s4273_s4 = inlined_call_operand.vmem [shape: f32[1,128], index: 4, kind: input, shape index: {}]   ;;  %s4274_s5 = inlined_call_operand.hbm [shape: f32[3,128,128], index: 5, kind: input, shape index: {}]   ;;  %s4275_s6 = inlined_call_operand.vmem [shape: f32[1,128], index: 6, kind: input, shape index: {}]   ;;  %s4276_s7 = inlined_call_operand.vmem [shape: f32[8,128], index: 7, kind: output, shape index: {}]  }
   0x1   :  { %13 = vsyncpa [#allocation5], 0  ;;  %s3415_s24 = smov [#allocation2]   ;;  %s3367_s28 = scalar_lea.hbm %s4272_s3, 6144 }
   0x2   :  { %s25_s25 = sshll.u32 %s3415_s24, 4  ;;  %p3368_p0 = scmp.ne.s32.totalorder %s4272_s3, %s3367_s28  ;;  %s26_s25 = int_to_ptr.vmem [resolvable:$true] %s25_s25 }
   0x3   :  { %p3371_p1 = scmp.lt.u32.totalorder %s3367_s28, %s4272_s3 }
   0x5   :  { %p3373_p2 = pnand %p3371_p1, %p3368_p0 }
   0x7   :  { %3376 = shalt.err (!%p3373_p2)
}
   0x8   :  { %s3377_s10 = scalar_lea.vmem %s26_s25, 6144  ;;  %p3382_p4 = scmp.lt.s32.totalorder %s26_s25, %s26_s25 }
   0x9   :  { %p3378_p3 = scmp.ne.s32.totalorder %s26_s25, %s3377_s10  ;;  %p3383_p5 = scmp.lt.s32.totalorder %s3377_s10, %s3377_s10 }
   0xb   :  { %p3384_p6 = por %p3383_p5, %p3382_p4 }
   0xd   :  { %p3385_p7 = pnand %p3384_p6, %p3378_p3 }
   0xf   :  { %3388 = shalt.err (!%p3385_p7)
}
  0x10   :  { %s3416_s11 = smov 128   ;;  %s3417_s12 = smov 8  }
  0x11   :  { %31 = dma.hbm_to_vmem [thread:$0]  %s4272_s3, 6144, %s26_s25, [#allocation3], %s3416_s11, %s3416_s11, %s3417_s12  }
  0x12   :  { %s3418_s15 = smov [#allocation4]   ;;  %s3389_s19 = scalar_lea.hbm %s4274_s5, 6144 }
  0x13   :  { %s39_s16 = sshll.u32 %s3418_s15, 4  ;;  %p3390_p8 = scmp.ne.s32.totalorder %s4274_s5, %s3389_s19  ;;  %s40_s16 = int_to_ptr.vmem [resolvable:$true] %s39_s16 }
  0x14   :  { %p3393_p9 = scmp.lt.u32.totalorder %s3389_s19, %s4274_s5 }
  0x16   :  { %p3395_p10 = pnand %p3393_p9, %p3390_p8 }
  0x18   :  { %3398 = shalt.err (!%p3395_p10)
}
  0x19   :  { %s3399_s24 = scalar_lea.vmem %s40_s16, 6144  ;;  %p3404_p12 = scmp.lt.s32.totalorder %s40_s16, %s40_s16 }
  0x1a   :  { %p3400_p11 = scmp.ne.s32.totalorder %s40_s16, %s3399_s24  ;;  %p3405_p13 = scmp.lt.s32.totalorder %s3399_s24, %s3399_s24 }
  0x1c   :  { %p3406_p0 = por %p3405_p13, %p3404_p12 }
  0x1e   :  { %p3407_p1 = pnand %p3406_p0, %p3400_p11 }
  0x20   :  { %3410 = shalt.err (!%p3407_p1)
}
  0x21   :  { %45 = dma.hbm_to_vmem [thread:$0]  %s4274_s5, 6144, %s40_s16, [#allocation5], %s3416_s11, %s3416_s11, %s3417_s12  }
  0x22   :  { %3411 = dma.done.wait [#allocation3], 6144  }
  0x23   :  { %3412 = vsyncadd [#allocation3], 4294961152 }
  0x24   :  { %3413 = dma.done.wait [#allocation5], 6144  }
  0x25   :  { %3414 = vsyncadd [#allocation5], 4294961152  ;;  %v56_v0 = vld [vmem:[%s4269_s0 + $0x8] sm:$0xf]  ;;  %v54_v1 = vld [vmem:[%s4269_s0] sm:$0xf]  ;;  %v338_v11 = vlaneseq }
  0x26   :  { %126 = vxpose.xlu1.b32.start.end [1/1] (short) (narrow) %v56_v0, 16  ;;  %62 = vxpose.xlu0.b32.start.end [1/1] (short) (narrow) %v54_v1, 16  ;;  %v57_v2 = vld [vmem:[%s4269_s0 + $0xc] sm:$0xf]  ;;  %v55_v3 = vld [vmem:[%s4269_s0 + $0x4] sm:$0xf] }
  0x27   :  { %v318_v4 = vld [vmem:[%s4270_s1] sm:$0xf]  ;;  %vm439_vm0 = vcmask 1043456   ;;  %v320_v5 = vld [vmem:[%s4270_s1 + $0x8] sm:$0xf]  ;;  %vm390_vm1 = vcmask 31744  }
  0x28   :  { %2670 = vmatprep.subr.msk.mxu0 %vm439_vm0, %v318_v4  ;;  %v59_v6 = vld [vmem:[%s4269_s0 + $0x14] sm:$0xf]  ;;  %v58_v7 = vld [vmem:[%s4269_s0 + $0x10] sm:$0xf]  ;;  %v319_v8 = vld [vmem:[%s4270_s1 + $0x4] sm:$0xf] }
  0x29   :  { %2671 = vmatpush3.msk.msra.mxu0 %vm439_vm0, %v318_v4  ;;  %2644 = vmatprep.subr.msk.mxu1 %vm439_vm0, %v319_v8  ;;  %v61_v9 = vld [vmem:[%s4269_s0 + $0x1c] sm:$0xf]  ;;  %v60_v10 = vld [vmem:[%s4269_s0 + $0x18] sm:$0xf]  ;;  %v3525_v14 = vshrl.u32 %v338_v11, 7  ;;  %vm2325_vm5 = vcmask 1041409  }
  0x2a   :  { %2696 = vmatprep.subr.msk.mxu0 %vm439_vm0, %v320_v5  ;;  %2645 = vmatpush3.msk.msra.mxu1 %vm439_vm0, %v319_v8  ;;  %vm2327_vm6 = vcmask 1042434   ;;  %vm2329_vm7 = vcmask 1043459   ;;  %vm2331_vm8 = vcmask 1044484   ;;  %vm2333_vm9 = vcmask 1045509  }
  0x2b   :  { %158 = vxpose.xlu1.b32.start.end [1/1] (short) (narrow) %v57_v2, 16  ;;  %94 = vxpose.xlu0.b32.start.end [1/1] (short) (narrow) %v55_v3, 16  ;;  %vm340_vm2 = vcmp.lt.s32.totalorder %v3525_v14, 7  ;;  %vm373_vm3 = vcmp.lt.s32.totalorder %v3525_v14, 6  ;;  %vm2335_vm10 = vcmask 1046534   ;;  %vm2337_vm11 = vcmask 1047559  }
  0x30   :  { %222 = vxpose.xlu1.b32.start.end [1/1] (short) (narrow) %v59_v6, 16  ;;  %190 = vxpose.xlu0.b32.start.end [1/1] (short) (narrow) %v58_v7, 16 }
  0x35   :  { %286 = vxpose.xlu1.b32.start.end [1/1] (short) (narrow) %v61_v9, 16  ;;  %254 = vxpose.xlu0.b32.start.end [1/1] (short) (narrow) %v60_v10, 16 }
  0xa6   :  { %v3521_v12 = vpop.trf.xlu1  ;;  %v3523_v13 = vpop.trf.xlu0 }
  0xa7   :  { %2672 = vmatprep.mubr.msk.f32.mxu0 %vm390_vm1, %v3523_v13  ;;  %v322_v17 = vrot.slane %v3523_v13, 1  ;;  %v326_v26 = vrot.slane %v3521_v12, 1  ;;  %v357_v59 = vrot.slane %v3523_v13, 2  ;;  %v361_v3 = vrot.slane %v3521_v12, 2 }
  0xaa   :  { %v3529_v15 = vpop.trf.xlu1  ;;  %v3531_v16 = vpop.trf.xlu0 }
  0xab   :  { %v323_v18 = vrot.slane %v3531_v16, 1  ;;  %2673 = vmatmul.mubr.msk.f32.vlgmr.msra.gmra.mrb[0].mxu0 %vm390_vm1, %v3531_v16  ;;  %v327_v27 = vrot.slane %v3529_v15, 1  ;;  %v358_v56 = vrot.slane %v3531_v16, 2  ;;  %v362_v4 = vrot.slane %v3529_v15, 2 }
  0xac   :  { %2697 = vmatpush3.msk.msra.mxu0 %vm439_vm0, %v320_v5 }
  0xad   :  { %v355_v19 = vsel %vm340_vm2, %v322_v17, %v323_v18  ;;  %v351_v35 = vsel %vm340_vm2, %v326_v26, %v327_v27  ;;  %v388_v0 = vsel %vm373_vm3, %v357_v59, %v358_v56  ;;  %v384_v9 = vsel %vm373_vm3, %v361_v3, %v362_v4 }
  0xae   :  { %v3543_v20 = vpop.trf.xlu1  ;;  %2646 = vmatprep.mubr.msk.f32.mxu1 %vm390_vm1, %v355_v19  ;;  %v3546_v21 = vpop.trf.xlu0 }
  0xaf   :  { %v324_v22 = vrot.slane %v3546_v21, 1  ;;  %2675 = vmatprep.mubr.msk.f32.mxu0 %vm390_vm1, %v3546_v21  ;;  %v328_v31 = vrot.slane %v3543_v20, 1  ;;  %v359_v61 = vrot.slane %v3546_v21, 2  ;;  %v363_v6 = vrot.slane %v3543_v20, 2 }
  0xb1   :  { %v354_v23 = vsel %vm340_vm2, %v323_v18, %v324_v22  ;;  %v350_v39 = vsel %vm340_vm2, %v327_v27, %v328_v31  ;;  %v387_v1 = vsel %vm373_vm3, %v358_v56, %v359_v61  ;;  %v383_v11 = vsel %vm373_vm3, %v362_v4, %v363_v6 }
  0xb2   :  { %v3553_v24 = vpop.trf.xlu1  ;;  %2647 = vmatmul.mubr.msk.f32.vlgmr.msra.gmra.mrb[0].mxu1 %vm390_vm1, %v354_v23  ;;  %v3556_v25 = vpop.trf.xlu0 }
  0xb3   :  { %v325_v28 = vrot.slane %v3556_v25, 1  ;;  %2676 = vmatmul.mubr.msk.f32.gmra.mrb[2].mxu0 %vm390_vm1, %v3556_v25  ;;  %v329_v34 = vrot.slane %v3553_v24, 1  ;;  %v360_v62 = vrot.slane %v3556_v25, 2  ;;  %v364_v8 = vrot.slane %v3553_v24, 2 }
  0xb4   :  { %2678 = vmatprep.mubr.msk.f32.mxu0 %vm390_vm1, %v3521_v12 }
  0xb5   :  { %v353_v29 = vsel %vm340_vm2, %v324_v22, %v325_v28  ;;  %v352_v30 = vsel %vm340_vm2, %v325_v28, %v326_v26  ;;  %v349_v41 = vsel %vm340_vm2, %v328_v31, %v329_v34  ;;  %v386_v5 = vsel %vm373_vm3, %v359_v61, %v360_v62  ;;  %v1051_v31 = vld [vmem:[#allocation2 + $0x88] sm:$0xff]  ;;  %v1652_v61 = vld [vmem:[#allocation4 + $0x80] sm:$0xff] }
  0xb6   :  { %v3570_v32 = vpop.trf.xlu1  ;;  %2649 = vmatprep.mubr.msk.f32.mxu1 %vm390_vm1, %v353_v29  ;;  %v3573_v33 = vpop.trf.xlu0  ;;  %v385_v7 = vsel %vm373_vm3, %v360_v62, %v361_v3  ;;  %v382_v13 = vsel %vm373_vm3, %v363_v6, %v364_v8  ;;  %v1653_v62 = vld [vmem:[#allocation4 + $0x88] sm:$0xff] }
  0xb7   :  { %2650 = vmatmul.mubr.msk.f32.gmra.mrb[2].mxu1 %vm390_vm1, %v352_v30  ;;  %2679 = vmatmul.mubr.msk.f32.gmra.mrb[4].mxu0 %vm390_vm1, %v3529_v15  ;;  %v330_v36 = vrot.slane %v3573_v33, 1  ;;  %v332_v42 = vrot.slane %v3570_v32, 1  ;;  %v365_v10 = vrot.slane %v3573_v33, 2  ;;  %v367_v15 = vrot.slane %v3570_v32, 2  ;;  %v1050_v30 = vld [vmem:[#allocation2 + $0x80] sm:$0xff]  ;;  %v1657_v6 = vld [vmem:[#allocation4 + $0xa8] sm:$0xff] }
  0xb8   :  { %2652 = vmatprep.mubr.msk.f32.mxu1 %vm390_vm1, %v351_v35  ;;  %2681 = vmatprep.mubr.msk.f32.mxu0 %vm390_vm1, %v3543_v20 }
  0xb9   :  { %v348_v43 = vsel %vm340_vm2, %v329_v34, %v330_v36  ;;  %v381_v16 = vsel %vm373_vm3, %v364_v8, %v365_v10  ;;  %v1053_v34 = vld [vmem:[#allocation2 + $0x98] sm:$0xff] }
  0xba   :  { %v3585_v37 = vpop.trf.xlu1  ;;  %v3587_v38 = vpop.trf.xlu0 }
  0xbb   :  { %v331_v40 = vrot.slane %v3587_v38, 1  ;;  %2653 = vmatmul.mubr.msk.f32.gmra.mrb[4].mxu1 %vm390_vm1, %v350_v39  ;;  %2682 = vmatmul.mubr.msk.f32.gmra.mrb[6].mxu0 %vm390_vm1, %v3553_v24  ;;  %v333_v45 = vrot.slane %v3585_v37, 1  ;;  %v366_v12 = vrot.slane %v3587_v38, 2  ;;  %v1056_v39 = vld [vmem:[#allocation2 + $0xb0] sm:$0xff] }
  0xbc   :  { %2655 = vmatprep.mubr.msk.f32.mxu1 %vm390_vm1, %v349_v41  ;;  %2684 = vmatprep.mubr.msk.f32.mxu0 %vm390_vm1, %v3573_v33  ;;  %v1052_v33 = vld [vmem:[#allocation2 + $0x90] sm:$0xff] }
  0xbd   :  { %v347_v46 = vsel %vm340_vm2, %v330_v36, %v331_v40  ;;  %v346_v49 = vsel %vm340_vm2, %v331_v40, %v332_v42  ;;  %v345_v52 = vsel %vm340_vm2, %v332_v42, %v333_v45  ;;  %v380_v18 = vsel %vm373_vm3, %v365_v10, %v366_v12  ;;  %v1054_v36 = vld [vmem:[#allocation2 + $0xa0] sm:$0xff]  ;;  %v1057_v40 = vld [vmem:[#allocation2 + $0xb8] sm:$0xff]  ;;  %v1658_v10 = vld [vmem:[#allocation4 + $0xb0] sm:$0xff] }
  0xbe   :  { %v3603_v44 = vpop.trf.xlu0  ;;  %v3611_v47 = vpop.trf.xlu1  ;;  %v379_v20 = vsel %vm373_vm3, %v366_v12, %v367_v15  ;;  %v3062_v35 = vpack.c.bf16 %v1053_v34, %v1052_v33  ;;  %v3070_v41 = vpack.c.bf16 %v1057_v40, %v1056_v39  ;;  %v1058_v42 = vld [vmem:[#allocation2 + $0xc0] sm:$0xff] }
  0xbf   :  { %2656 = vmatmul.mubr.msk.f32.gmra.mrb[6].mxu1 %vm390_vm1, %v348_v43  ;;  %2685 = vmatmul.mubr.msk.f32.gmra.mrb[8].mxu0 %vm390_vm1, %v3587_v38  ;;  %v334_v48 = vrot.slane %v3603_v44, 1  ;;  %v336_v53 = vrot.slane %v3611_v47, 1  ;;  %v369_v19 = vrot.slane %v3603_v44, 2  ;;  %v371_v23 = vrot.slane %v3611_v47, 2  ;;  %v1059_v43 = vld [vmem:[#allocation2 + $0xc8] sm:$0xff] }
  0xc0   :  { %2658 = vmatprep.mubr.msk.f32.mxu1 %vm390_vm1, %v347_v46  ;;  %2687 = vmatprep.mubr.msk.f32.mxu0 %vm390_vm1, %v3570_v32  ;;  %v3058_v32 = vpack.c.bf16 %v1051_v31, %v1050_v30  ;;  %v1061_v46 = vld [vmem:[#allocation2 + $0xd8] sm:$0xff] }
  0xc1   :  { %v344_v54 = vsel %vm340_vm2, %v333_v45, %v334_v48  ;;  %v1060_v45 = vld [vmem:[#allocation2 + $0xd0] sm:$0xff] }
  0xc2   :  { %v3619_v50 = vpop.trf.xlu0  ;;  %v3633_v55 = vpop.trf.xlu1  ;;  %3059 = vmatprep.subr.bf16.mxu1 %v3058_v32 }
  0xc3   :  { %v335_v51 = vrot.slane %v3619_v50, 1  ;;  %2659 = vmatmul.mubr.msk.f32.gmra.mrb[8].mxu1 %vm390_vm1, %v346_v49  ;;  %2688 = vmatmul.mubr.msk.f32.gmra.mrb[10].mxu0 %vm390_vm1, %v3585_v37  ;;  %v337_v60 = vrot.slane %v3633_v55, 1  ;;  %v370_v21 = vrot.slane %v3619_v50, 2  ;;  %v372_v26 = vrot.slane %v3633_v55, 2  ;;  %v1063_v49 = vld [vmem:[#allocation2 + $0xe8] sm:$0xff] }
  0xc4   :  { %2661 = vmatprep.mubr.msk.f32.mxu1 %vm390_vm1, %v345_v52  ;;  %2690 = vmatprep.mubr.msk.f32.mxu0 %vm390_vm1, %v3603_v44  ;;  %v3074_v44 = vpack.c.bf16 %v1059_v43, %v1058_v42  ;;  %v1065_v52 = vld [vmem:[#allocation2 + $0xf8] sm:$0xff] }
  0xc5   :  { %v343_v57 = vsel %vm340_vm2, %v334_v48, %v335_v51  ;;  %v342_v58 = vsel %vm340_vm2, %v335_v51, %v336_v53  ;;  %v341_v63 = vsel %vm340_vm2, %v336_v53, %v337_v60  ;;  %v356_v2 = vsel %vm340_vm2, %v337_v60, %v322_v17  ;;  %3061 = vmatpush3.bf16.msra.mxu1 %v3058_v32  ;;  %v1062_v48 = vld [vmem:[#allocation2 + $0xe0] sm:$0xff]  ;;  %v1064_v51 = vld [vmem:[#allocation2 + $0xf0] sm:$0xff] }
  0xc6   :  { %v368_v17 = vrot.slane %v3585_v37, 2  ;;  %v376_v25 = vsel %vm373_vm3, %v369_v19, %v370_v21  ;;  %v375_v27 = vsel %vm373_vm3, %v370_v21, %v371_v23  ;;  %v374_v28 = vsel %vm373_vm3, %v371_v23, %v372_v26  ;;  %3063 = vmatprep.subr.bf16.mxu1 %v3062_v35  ;;  %v1055_v37 = vld [vmem:[#allocation2 + $0xa8] sm:$0xff] }
  0xc7   :  { %2662 = vmatmul.mubr.msk.f32.gmra.mrb[10].mxu1 %vm390_vm1, %v344_v54  ;;  %2691 = vmatmul.mubr.msk.f32.gmra.mrb[12].mxu0 %vm390_vm1, %v3619_v50  ;;  %v389_v29 = vsel %vm373_vm3, %v372_v26, %v357_v59  ;;  %v3066_v38 = vpack.c.bf16 %v1055_v37, %v1054_v36  ;;  %v3082_v50 = vpack.c.bf16 %v1063_v49, %v1062_v48  ;;  %v1034_v54 = vld [vmem:[#allocation2] sm:$0xff] }
  0xc8   :  { %2664 = vmatprep.mubr.msk.f32.mxu1 %vm390_vm1, %v343_v57  ;;  %2693 = vmatprep.mubr.msk.f32.mxu0 %vm390_vm1, %v3611_v47  ;;  %v378_v22 = vsel %vm373_vm3, %v367_v15, %v368_v17  ;;  %v377_v24 = vsel %vm373_vm3, %v368_v17, %v369_v19  ;;  %v3078_v47 = vpack.c.bf16 %v1061_v46, %v1060_v45  ;;  %v1661_v17 = vld [vmem:[#allocation4 + $0xc8] sm:$0xff] }
  0xc9   :  { %3065 = vmatpush3.bf16.msra.mxu1 %v3062_v35  ;;  %v3086_v53 = vpack.c.bf16 %v1065_v52, %v1064_v51  ;;  %v1036_v51 = vld [vmem:[#allocation2 + $0x10] sm:$0xff]  ;;  %v1037_v52 = vld [vmem:[#allocation2 + $0x18] sm:$0xff] }
  0xca   :  { %3067 = vmatprep.subr.bf16.mxu1 %v3066_v38 }
  0xcb   :  { %2665 = vmatmul.mubr.msk.f32.gmra.mrb[12].mxu1 %vm390_vm1, %v342_v58  ;;  %2694 = vmatmul.mubr.msk.f32.gmra.mrb[14].mxu0 %vm390_vm1, %v3633_v55  ;;  %v1035_v55 = vld [vmem:[#allocation2 + $0x8] sm:$0xff] }
  0xcc   :  { %2667 = vmatprep.mubr.msk.f32.mxu1 %vm390_vm1, %v341_v63  ;;  %2698 = vmatprep.mubr.msk.f32.mxu0 %vm390_vm1, %v388_v0  ;;  %v3722_v56 = vpack.c.bf16 %v1035_v55, %v1034_v54  ;;  %v1654_v63 = vld [vmem:[#allocation4 + $0x90] sm:$0xff] }
  0xcd   :  { %3069 = vmatpush3.bf16.msra.mxu1 %v3066_v38 }
  0xce   :  { %3071 = vmatprep.subr.bf16.mxu1 %v3070_v41 }
  0xcf   :  { %2668 = vmatmul.mubr.msk.f32.gmra.mrb[14].mxu1 %vm390_vm1, %v356_v2  ;;  %2699 = vmatmul.mubr.msk.f32.vlgmr.msra.gmra.mrb[0].mxu0 %vm390_vm1, %v387_v1  ;;  %v3154_v1 = vpack.c.bf16 %v1653_v62, %v1652_v61  ;;  %v1655_v2 = vld [vmem:[#allocation4 + $0x98] sm:$0xff] }
  0xd0   :  { %2701 = vmatprep.mubr.msk.f32.mxu0 %vm390_vm1, %v386_v5  ;;  %v3158_v4 = vpack.c.bf16 %v1655_v2, %v1654_v63  ;;  %v1656_v5 = vld [vmem:[#allocation4 + $0xa0] sm:$0xff] }
  0xd1   :  { %3073 = vmatpush3.bf16.msra.mxu1 %v3070_v41  ;;  %3155 = vmatprep.subr.bf16.mxu0 %v3154_v1  ;;  %v3162_v8 = vpack.c.bf16 %v1657_v6, %v1656_v5  ;;  %v1038_v6 = vld [vmem:[#allocation2 + $0x20] sm:$0xff] }
  0xd2   :  { %3075 = vmatprep.subr.bf16.mxu1 %v3074_v44  ;;  %3157 = vmatpush3.bf16.msra.mxu0 %v3154_v1  ;;  %v3094_v1 = vpack.c.bf16 %v1037_v52, %v1036_v51 }
  0xd3   :  { %2702 = vmatmul.mubr.msk.f32.gmra.mrb[2].mxu0 %vm390_vm1, %v385_v7  ;;  %3159 = vmatprep.subr.bf16.mxu0 %v3158_v4 }
  0xd4   :  { %2704 = vmatprep.mubr.msk.f32.mxu0 %vm390_vm1, %v384_v9 }
  0xd5   :  { %3077 = vmatpush3.bf16.msra.mxu1 %v3074_v44 }
  0xd6   :  { %3079 = vmatprep.subr.bf16.mxu1 %v3078_v47  ;;  %3161 = vmatpush3.bf16.msra.mxu0 %v3158_v4 }
  0xd7   :  { %2705 = vmatmul.mubr.msk.f32.gmra.mrb[4].mxu0 %vm390_vm1, %v383_v11  ;;  %v1659_v11 = vld [vmem:[#allocation4 + $0xb8] sm:$0xff]  ;;  %3163 = vmatprep.subr.bf16.mxu0 %v3162_v8 }
  0xd8   :  { %2707 = vmatprep.mubr.msk.f32.mxu0 %vm390_vm1, %v382_v13  ;;  %v3166_v13 = vpack.c.bf16 %v1659_v11, %v1658_v10 }
  0xd9   :  { %3081 = vmatpush3.bf16.msra.mxu1 %v3078_v47 }
  0xda   :  { %3083 = vmatprep.subr.bf16.mxu1 %v3082_v50  ;;  %3165 = vmatpush3.bf16.msra.mxu0 %v3162_v8  ;;  %v1039_v8 = vld [vmem:[#allocation2 + $0x28] sm:$0xff] }
  0xdb   :  { %2708 = vmatmul.mubr.msk.f32.gmra.mrb[6].mxu0 %vm390_vm1, %v381_v16  ;;  %v1660_v16 = vld [vmem:[#allocation4 + $0xc0] sm:$0xff]  ;;  %3167 = vmatprep.subr.bf16.mxu0 %v3166_v13 }
  0xdc   :  { %2710 = vmatprep.mubr.msk.f32.mxu0 %vm390_vm1, %v380_v18  ;;  %v3170_v19 = vpack.c.bf16 %v1661_v17, %v1660_v16 }
  0xdd   :  { %3085 = vmatpush3.bf16.msra.mxu1 %v3082_v50 }
  0xde   :  { %3087 = vmatprep.subr.bf16.mxu1 %v3086_v53  ;;  %3169 = vmatpush3.bf16.msra.mxu0 %v3166_v13 }
  0xdf   :  { %2711 = vmatmul.mubr.msk.f32.gmra.mrb[8].mxu0 %vm390_vm1, %v379_v20  ;;  %3171 = vmatprep.subr.bf16.mxu0 %v3170_v19 }
  0xe0   :  { %2713 = vmatprep.mubr.msk.f32.mxu0 %vm390_vm1, %v378_v22 }
  0xe1   :  { %3089 = vmatpush3.bf16.msra.mxu1 %v3086_v53 }
  0xe2   :  { %3091 = vmatprep.subr.bf16.mxu1 %v3722_v56  ;;  %3173 = vmatpush3.bf16.msra.mxu0 %v3170_v19 }
  0xe3   :  { %2714 = vmatmul.mubr.msk.f32.gmra.mrb[10].mxu0 %vm390_vm1, %v377_v24  ;;  %v3746_v24 = vld [vmem:[%s4271_s2] ss:$0 sm:$0xff] }
  0xe4   :  { %2716 = vmatprep.mubr.msk.f32.mxu0 %vm390_vm1, %v376_v25 }
  0xe7   :  { %2717 = vmatmul.mubr.msk.f32.gmra.mrb[12].mxu0 %vm390_vm1, %v375_v27 }
  0xe8   :  { %2719 = vmatprep.mubr.msk.f32.mxu0 %vm390_vm1, %v374_v28 }
  0xeb   :  { %2720 = vmatmul.mubr.msk.f32.gmra.mrb[14].mxu0 %vm390_vm1, %v389_v29 }
 0x185   :  { %v2648_v57 = vpop.f32.mrb[0].mxu1 }
 0x186   :  { %v509_v58 = vpop.f32.mrb[1].mxu1 }
 0x18a   :  { %v2651_v59 = vpop.f32.mrb[2].mxu1 }
 0x18b   :  { %v519_v60 = vpop.f32.mrb[3].mxu1 }
 0x18e   :  { %v2654_v0 = vpop.f32.mrb[4].mxu1 }
 0x18f   :  { %v529_v3 = vpop.f32.mrb[5].mxu1 }
 0x192   :  { %v3725_v7 = vpop.f32.mrb[6].mxu1 }
 0x193   :  { %v3727_v9 = vpop.f32.mrb[7].mxu1 }
 0x196   :  { %v3729_v12 = vpop.f32.mrb[8].mxu1 }
 0x197   :  { %v3731_v15 = vpop.f32.mrb[9].mxu1 }
 0x19a   :  { %v3733_v18 = vpop.f32.mrb[10].mxu1 }
 0x19b   :  { %v3735_v20 = vpop.f32.mrb[11].mxu1 }
 0x19e   :  { %v3737_v21 = vpop.f32.mrb[12].mxu1 }
 0x19f   :  { %v3739_v22 = vpop.f32.mrb[13].mxu1 }
 0x1a2   :  { %v3741_v23 = vpop.f32.mrb[14].mxu1  ;;  %v2700_v25 = vpop.f32.mrb[0].mxu0 }
 0x1a3   :  { %v3266_v26 = vadd.f32 %v2700_v25, %v2648_v57  ;;  %v3748_v27 = vpop.f32.mrb[15].mxu1  ;;  %v901_v28 = vpop.f32.mrb[1].mxu0 }
 0x1a4   :  { %v3267_v29 = vadd.f32 %v901_v28, %v509_v58 }
 0x1a5   :  { %v1003_v30 = vadd.f32 %v3266_v26, %v3746_v24 }
 0x1a6   :  { %v1002_v31 = vadd.f32 %v3267_v29, %v3746_v24  ;;  %v2703_v32 = vpop.f32.mrb[2].mxu0 }
 0x1a7   :  { %v3752_v33 = vmax.f32 %v1003_v30, 0.0  ;;  %v3268_v34 = vadd.f32 %v2703_v32, %v2651_v59  ;;  %v911_v35 = vpop.f32.mrb[3].mxu0  ;;  %v3098_v30 = vpack.c.bf16 %v1039_v8, %v1038_v6 }
 0x1a8   :  { %v3754_v36 = vmax.f32 %v1002_v31, 0.0  ;;  %v3269_v37 = vadd.f32 %v911_v35, %v519_v60  ;;  %v1040_v35 = vld [vmem:[#allocation2 + $0x30] sm:$0xff] }
 0x1a9   :  { %v1005_v38 = vadd.f32 %v3268_v34, %v3746_v24  ;;  %v1084_v39 = vrot.slane %v3752_v33, 1  ;;  %v1116_v40 = vrot.slane %v3752_v33, 2 }
 0x1aa   :  { %v1004_v41 = vadd.f32 %v3269_v37, %v3746_v24  ;;  %v2706_v42 = vpop.f32.mrb[4].mxu0  ;;  %v1083_v43 = vrot.slane %v3754_v36, 1  ;;  %v1115_v44 = vrot.slane %v3754_v36, 2  ;;  %v1041_v37 = vld [vmem:[#allocation2 + $0x38] sm:$0xff] }
 0x1ab   :  { %v3762_v45 = vmax.f32 %v1005_v38, 0.0  ;;  %v3270_v46 = vadd.f32 %v2706_v42, %v2654_v0  ;;  %v921_v47 = vpop.f32.mrb[5].mxu0  ;;  %v3102_v52 = vpack.c.bf16 %v1041_v37, %v1040_v35 }
 0x1ac   :  { %v3764_v48 = vmax.f32 %v1004_v41, 0.0  ;;  %v3271_v49 = vadd.f32 %v921_v47, %v529_v3  ;;  %v1113_v50 = vsel %vm340_vm2, %v1083_v43, %v1084_v39  ;;  %v3774_v53 = vsel %vm373_vm3, %v1115_v44, %v1116_v40 }
 0x1ad   :  { %v1007_v54 = vadd.f32 %v3270_v46, %v3746_v24  ;;  %2754 = vmatprep.mubr.f32.mxu1 %v1113_v50  ;;  %v1086_v55 = vrot.slane %v3762_v45, 1  ;;  %v1118_v57 = vrot.slane %v3762_v45, 2 }
 0x1ae   :  { %v1085_v58 = vrot.slane %v3764_v48, 1  ;;  %v1117_v59 = vrot.slane %v3764_v48, 2  ;;  %v1006_v60 = vadd.f32 %v3271_v49, %v3746_v24  ;;  %v2709_v61 = vpop.f32.mrb[6].mxu0 }
 0x1af   :  { %v3782_v62 = vmax.f32 %v1007_v54, 0.0  ;;  %v3272_v63 = vadd.f32 %v2709_v61, %v3725_v7  ;;  %v931_v0 = vpop.f32.mrb[7].mxu0 }
 0x1b0   :  { %v3785_v2 = vmax.f32 %v1006_v60, 0.0  ;;  %v3273_v3 = vadd.f32 %v931_v0, %v3727_v9  ;;  %v1112_v4 = vsel %vm340_vm2, %v1084_v39, %v1085_v58  ;;  %v1111_v5 = vsel %vm340_vm2, %v1085_v58, %v1086_v55  ;;  %v1043_v60 = vld [vmem:[#allocation2 + $0x48] sm:$0xff] }
 0x1b1   :  { %v1009_v10 = vadd.f32 %v3272_v63, %v3746_v24  ;;  %2755 = vmatmul.mubr.f32.vlgmr.msra.gmra.mrb[16].mxu1 %v1112_v4  ;;  %v1088_v11 = vrot.slane %v3782_v62, 1  ;;  %v3796_v7 = vsel %vm373_vm3, %v1116_v40, %v1117_v59  ;;  %v3800_v9 = vsel %vm373_vm3, %v1117_v59, %v1118_v57  ;;  %v1042_v59 = vld [vmem:[#allocation2 + $0x40] sm:$0xff] }
 0x1b2   :  { %v1008_v13 = vadd.f32 %v3273_v3, %v3746_v24  ;;  %3093 = vmatpush3.bf16.msra.mxu1 %v3722_v56  ;;  %v2712_v16 = vpop.f32.mrb[8].mxu0  ;;  %2757 = vmatprep.mubr.f32.mxu1 %v1111_v5  ;;  %v1087_v17 = vrot.slane %v3785_v2, 1  ;;  %v1119_v19 = vrot.slane %v3785_v2, 2  ;;  %v1120_v25 = vrot.slane %v3782_v62, 2 }
 0x1b3   :  { %v3807_v26 = vmax.f32 %v1009_v10, 0.0  ;;  %v3274_v28 = vadd.f32 %v2712_v16, %v3729_v12  ;;  %v941_v29 = vpop.f32.mrb[9].mxu0  ;;  %3095 = vmatprep.subr.bf16.mxu1 %v3094_v1 }
 0x1b4   :  { %v3810_v31 = vmax.f32 %v1008_v13, 0.0  ;;  %v3275_v32 = vadd.f32 %v941_v29, %v3731_v15  ;;  %v1110_v56 = vsel %vm340_vm2, %v1086_v55, %v1087_v17  ;;  %v1109_v34 = vsel %vm340_vm2, %v1087_v17, %v1088_v11 }
 0x1b5   :  { %v1011_v38 = vadd.f32 %v3274_v28, %v3746_v24  ;;  %2758 = vmatmul.mubr.f32.gmra.mrb[18].mxu1 %v1110_v56  ;;  %v1090_v12 = vrot.slane %v3807_v26, 1  ;;  %v3821_v39 = vsel %vm373_vm3, %v1118_v57, %v1119_v19  ;;  %v3825_v15 = vsel %vm373_vm3, %v1119_v19, %v1120_v25  ;;  %v1045_v28 = vld [vmem:[#allocation2 + $0x58] sm:$0xff] }
 0x1b6   :  { %v1010_v40 = vadd.f32 %v3275_v32, %v3746_v24  ;;  %3097 = vmatpush3.bf16.msra.mxu1 %v3094_v1  ;;  %v2715_v41 = vpop.f32.mrb[10].mxu0  ;;  %2760 = vmatprep.mubr.f32.mxu1 %v1109_v34  ;;  %v1089_v42 = vrot.slane %v3810_v31, 1  ;;  %v1121_v46 = vrot.slane %v3810_v31, 2  ;;  %v1122_v47 = vrot.slane %v3807_v26, 2 }
 0x1b7   :  { %v3831_v49 = vmax.f32 %v1011_v38, 0.0  ;;  %v3276_v50 = vadd.f32 %v2715_v41, %v3733_v18  ;;  %v951_v51 = vpop.f32.mrb[11].mxu0  ;;  %3099 = vmatprep.subr.bf16.mxu1 %v3098_v30 }
 0x1b8   :  { %v3834_v54 = vmax.f32 %v1010_v40, 0.0  ;;  %v3277_v55 = vadd.f32 %v951_v51, %v3735_v20  ;;  %v1108_v57 = vsel %vm340_vm2, %v1088_v11, %v1089_v42  ;;  %v1107_v58 = vsel %vm340_vm2, %v1089_v42, %v1090_v12  ;;  %v1046_v51 = vld [vmem:[#allocation2 + $0x60] sm:$0xff] }
 0x1b9   :  { %v1013_v61 = vadd.f32 %v3276_v50, %v3746_v24  ;;  %2761 = vmatmul.mubr.f32.gmra.mrb[20].mxu1 %v1108_v57  ;;  %v1092_v18 = vrot.slane %v3831_v49, 1  ;;  %v3845_v63 = vsel %vm373_vm3, %v1120_v25, %v1121_v46  ;;  %v3849_v20 = vsel %vm373_vm3, %v1121_v46, %v1122_v47  ;;  %v1044_v25 = vld [vmem:[#allocation2 + $0x50] sm:$0xff] }
 0x1ba   :  { %v1012_v0 = vadd.f32 %v3277_v55, %v3746_v24  ;;  %3101 = vmatpush3.bf16.msra.mxu1 %v3098_v30  ;;  %v2718_v1 = vpop.f32.mrb[12].mxu0  ;;  %2763 = vmatprep.mubr.f32.mxu1 %v1107_v58  ;;  %v1091_v3 = vrot.slane %v3834_v54, 1  ;;  %v1123_v4 = vrot.slane %v3834_v54, 2  ;;  %v1124_v5 = vrot.slane %v3831_v49, 2 }
 0x1bb   :  { %v3855_v6 = vmax.f32 %v1013_v61, 0.0  ;;  %v3278_v8 = vadd.f32 %v2718_v1, %v3737_v21  ;;  %v961_v10 = vpop.f32.mrb[13].mxu0  ;;  %3103 = vmatprep.subr.bf16.mxu1 %v3102_v52  ;;  %v3106_v11 = vpack.c.bf16 %v1043_v60, %v1042_v59  ;;  %v3110_v41 = vpack.c.bf16 %v1045_v28, %v1044_v25 }
 0x1bc   :  { %v3858_v13 = vmax.f32 %v1012_v0, 0.0  ;;  %v3279_v16 = vadd.f32 %v961_v10, %v3739_v22  ;;  %v1106_v17 = vsel %vm340_vm2, %v1090_v12, %v1091_v3  ;;  %v1105_v19 = vsel %vm340_vm2, %v1091_v3, %v1092_v18 }
 0x1bd   :  { %v1015_v29 = vadd.f32 %v3278_v8, %v3746_v24  ;;  %2764 = vmatmul.mubr.f32.gmra.mrb[22].mxu1 %v1106_v17  ;;  %v1094_v21 = vrot.slane %v3855_v6, 1  ;;  %v3869_v30 = vsel %vm373_vm3, %v1122_v47, %v1123_v4  ;;  %v3873_v22 = vsel %vm373_vm3, %v1123_v4, %v1124_v5  ;;  %v1048_v4 = vld [vmem:[#allocation2 + $0x70] sm:$0xff] }
 0x1be   :  { %v1014_v32 = vadd.f32 %v3279_v16, %v3746_v24  ;;  %3105 = vmatpush3.bf16.msra.mxu1 %v3102_v52  ;;  %v2721_v56 = vpop.f32.mrb[14].mxu0  ;;  %2766 = vmatprep.mubr.f32.mxu1 %v1105_v19  ;;  %v1093_v34 = vrot.slane %v3858_v13, 1  ;;  %v1125_v35 = vrot.slane %v3858_v13, 2  ;;  %v1126_v37 = vrot.slane %v3855_v6, 2  ;;  %v1047_v52 = vld [vmem:[#allocation2 + $0x68] sm:$0xff] }
 0x1bf   :  { %v3879_v38 = vmax.f32 %v1015_v29, 0.0  ;;  %v3280_v12 = vadd.f32 %v2721_v56, %v3741_v23  ;;  %v971_v40 = vpop.f32.mrb[15].mxu0  ;;  %3107 = vmatprep.subr.bf16.mxu1 %v3106_v11  ;;  %v3114_v0 = vpack.c.bf16 %v1047_v52, %v1046_v51  ;;  %v1066_v56 = vld [vmem:[#allocation2 + $0x100] sm:$0xff]  ;;  %v1073_v51 = vld [vmem:[#allocation2 + $0x138] sm:$0xff] }
 0x1c0   :  { %v3882_v42 = vmax.f32 %v1014_v32, 0.0  ;;  %v3281_v46 = vadd.f32 %v971_v40, %v3748_v27  ;;  %v1104_v47 = vsel %vm340_vm2, %v1092_v18, %v1093_v34  ;;  %v1103_v50 = vsel %vm340_vm2, %v1093_v34, %v1094_v21  ;;  %v1067_v34 = vld [vmem:[#allocation2 + $0x108] sm:$0xff]  ;;  %v1074_v52 = vld [vmem:[#allocation2 + $0x140] sm:$0xff] }
 0x1c1   :  { %v1017_v55 = vadd.f32 %v3280_v12, %v3746_v24  ;;  %2767 = vmatmul.mubr.f32.gmra.mrb[24].mxu1 %v1104_v47  ;;  %v1096_v23 = vrot.slane %v3879_v38, 1  ;;  %v3893_v57 = vsel %vm373_vm3, %v1124_v5, %v1125_v35  ;;  %v3897_v27 = vsel %vm373_vm3, %v1125_v35, %v1126_v37  ;;  %v1049_v5 = vld [vmem:[#allocation2 + $0x78] sm:$0xff] }
 0x1c2   :  { %v1016_v58 = vadd.f32 %v3281_v46, %v3746_v24  ;;  %3109 = vmatpush3.bf16.msra.mxu1 %v3106_v11  ;;  %2769 = vmatprep.mubr.f32.mxu1 %v1103_v50  ;;  %v1095_v59 = vrot.slane %v3882_v42, 1  ;;  %v1127_v60 = vrot.slane %v3882_v42, 2  ;;  %v1128_v61 = vrot.slane %v3879_v38, 2  ;;  %v1069_v12 = vld [vmem:[#allocation2 + $0x118] sm:$0xff]  ;;  %v1071_v46 = vld [vmem:[#allocation2 + $0x128] sm:$0xff]  ;;  %v1072_v50 = vld [vmem:[#allocation2 + $0x130] sm:$0xff] }
 0x1c3   :  { %v3903_v18 = vmax.f32 %v1017_v55, 0.0  ;;  %3111 = vmatprep.subr.bf16.mxu1 %v3110_v41  ;;  %v3118_v25 = vpack.c.bf16 %v1049_v5, %v1048_v4  ;;  %v1075_v55 = vld [vmem:[#allocation2 + $0x148] sm:$0xff] }
 0x1c4   :  { %v3905_v1 = vmax.f32 %v1016_v58, 0.0  ;;  %v1102_v3 = vsel %vm340_vm2, %v1094_v21, %v1095_v59  ;;  %v1101_v24 = vsel %vm340_vm2, %v1095_v59, %v1096_v23  ;;  %v3913_v8 = vsel %vm373_vm3, %v1126_v37, %v1127_v60  ;;  %v1068_v37 = vld [vmem:[#allocation2 + $0x110] sm:$0xff]  ;;  %v1079_v58 = vld [vmem:[#allocation2 + $0x168] sm:$0xff]  ;;  %v1081_v59 = vld [vmem:[#allocation2 + $0x178] sm:$0xff] }
 0x1c5   :  { %2770 = vmatmul.mubr.f32.gmra.mrb[26].mxu1 %v1102_v3  ;;  %v1098_v10 = vrot.slane %v3903_v18, 1  ;;  %v3918_v11 = vsel %vm373_vm3, %v1127_v60, %v1128_v61  ;;  %v1130_v16 = vrot.slane %v3903_v18, 2  ;;  %v3126_v40 = vpack.c.bf16 %v1069_v12, %v1068_v37  ;;  %v1669_v60 = vld [vmem:[#allocation4 + $0x108] sm:$0xff] }
 0x1c6   :  { %3113 = vmatpush3.bf16.msra.mxu1 %v3110_v41  ;;  %2772 = vmatprep.mubr.f32.mxu1 %v1101_v24  ;;  %v1097_v17 = vrot.slane %v3905_v1, 1  ;;  %v1129_v19 = vrot.slane %v3905_v1, 2  ;;  %v1070_v41 = vld [vmem:[#allocation2 + $0x120] sm:$0xff]  ;;  %v1637_v3 = vld [vmem:[#allocation4 + $0x8] sm:$0xff] }
 0x1c7   :  { %3115 = vmatprep.subr.bf16.mxu1 %v3114_v0  ;;  %v1114_v28 = vsel %vm340_vm2, %v1098_v10, %v1083_v43  ;;  %v3931_v29 = vsel %vm373_vm3, %v1130_v16, %v1115_v44  ;;  %v3122_v44 = vpack.c.bf16 %v1067_v34, %v1066_v56  ;;  %v3130_v47 = vpack.c.bf16 %v1071_v46, %v1070_v41  ;;  %v1676_v24 = vld [vmem:[#allocation4 + $0x140] sm:$0xff]  ;;  %v1677_v5 = vld [vmem:[#allocation4 + $0x148] sm:$0xff] }
 0x1c8   :  { %v1100_v21 = vsel %vm340_vm2, %v1096_v23, %v1097_v17  ;;  %v1099_v32 = vsel %vm340_vm2, %v1097_v17, %v1098_v10  ;;  %v3939_v35 = vsel %vm373_vm3, %v1128_v61, %v1129_v19  ;;  %v3943_v43 = vsel %vm373_vm3, %v1129_v19, %v1130_v16  ;;  %v1077_v23 = vld [vmem:[#allocation2 + $0x158] sm:$0xff]  ;;  %v1678_v10 = vld [vmem:[#allocation4 + $0x150] sm:$0xff]  ;;  %v1680_v17 = vld [vmem:[#allocation4 + $0x160] sm:$0xff] }
 0x1c9   :  { %2773 = vmatmul.mubr.f32.gmra.mrb[28].mxu1 %v1100_v21  ;;  %v1681_v19 = vld [vmem:[#allocation4 + $0x168] sm:$0xff] }
 0x1ca   :  { %3117 = vmatpush3.bf16.msra.mxu1 %v3114_v0  ;;  %2775 = vmatprep.mubr.f32.mxu1 %v1099_v32  ;;  %v4015_v32 = vld [vmem:[%s4273_s4] ss:$0 sm:$0xff] }
 0x1cb   :  { %3119 = vmatprep.subr.bf16.mxu1 %v3118_v25 }
 0x1cd   :  { %2776 = vmatmul.mubr.f32.gmra.mrb[30].mxu1 %v1114_v28  ;;  %v1682_v28 = vld [vmem:[#allocation4 + $0x170] sm:$0xff] }
 0x1ce   :  { %3121 = vmatpush3.bf16.msra.mxu1 %v3118_v25  ;;  %2810 = vmatprep.mubr.f32.mxu1 %v3754_v36  ;;  %v3134_v36 = vpack.c.bf16 %v1073_v51, %v1072_v50  ;;  %v4004_v25 = vpack.c.bf16 %v1681_v19, %v1680_v17 }
 0x1cf   :  { %3123 = vmatprep.subr.bf16.mxu1 %v3122_v44 }
 0x1d1   :  { %2811 = vmatmul.mubr.f32.vlgmr.msra.gmra.mrb[16].mxu1 %v3752_v33  ;;  %v3138_v33 = vpack.c.bf16 %v1075_v55, %v1074_v52 }
 0x1d2   :  { %3125 = vmatpush3.bf16.msra.mxu1 %v3122_v44  ;;  %2813 = vmatprep.mubr.f32.mxu1 %v3764_v48  ;;  %v1076_v48 = vld [vmem:[#allocation2 + $0x150] sm:$0xff] }
 0x1d3   :  { %3127 = vmatprep.subr.bf16.mxu1 %v3126_v40 }
 0x1d5   :  { %2814 = vmatmul.mubr.f32.gmra.mrb[18].mxu1 %v3762_v45  ;;  %v3142_v45 = vpack.c.bf16 %v1077_v23, %v1076_v48  ;;  %v1638_v23 = vld [vmem:[#allocation4 + $0x10] sm:$0xff] }
 0x1d6   :  { %3129 = vmatpush3.bf16.msra.mxu1 %v3126_v40  ;;  %2816 = vmatprep.mubr.f32.mxu1 %v3785_v2  ;;  %v1078_v2 = vld [vmem:[#allocation2 + $0x160] sm:$0xff] }
 0x1d7   :  { %3131 = vmatprep.subr.bf16.mxu1 %v3130_v47 }
 0x1d9   :  { %2817 = vmatmul.mubr.f32.gmra.mrb[20].mxu1 %v3782_v62  ;;  %v3146_v62 = vpack.c.bf16 %v1079_v58, %v1078_v2 }
 0x1da   :  { %3133 = vmatpush3.bf16.msra.mxu1 %v3130_v47  ;;  %2819 = vmatprep.mubr.f32.mxu1 %v3810_v31  ;;  %v1080_v31 = vld [vmem:[#allocation2 + $0x170] sm:$0xff] }
 0x1db   :  { %3135 = vmatprep.subr.bf16.mxu1 %v3134_v36 }
 0x1dd   :  { %2820 = vmatmul.mubr.f32.gmra.mrb[22].mxu1 %v3807_v26  ;;  %v3150_v26 = vpack.c.bf16 %v1081_v59, %v1080_v31 }
 0x1de   :  { %3137 = vmatpush3.bf16.msra.mxu1 %v3134_v36  ;;  %2822 = vmatprep.mubr.f32.mxu1 %v3834_v54  ;;  %v1668_v54 = vld [vmem:[#allocation4 + $0x100] sm:$0xff] }
 0x1df   :  { %3139 = vmatprep.subr.bf16.mxu1 %v3138_v33 }
 0x1e1   :  { %2823 = vmatmul.mubr.f32.gmra.mrb[24].mxu1 %v3831_v49  ;;  %v3960_v49 = vpack.c.bf16 %v1669_v60, %v1668_v54 }
 0x1e2   :  { %3141 = vmatpush3.bf16.msra.mxu1 %v3138_v33  ;;  %2825 = vmatprep.mubr.f32.mxu1 %v3858_v13  ;;  %v1672_v13 = vld [vmem:[#allocation4 + $0x120] sm:$0xff] }
 0x1e3   :  { %3143 = vmatprep.subr.bf16.mxu1 %v3142_v45 }
 0x1e5   :  { %2826 = vmatmul.mubr.f32.gmra.mrb[26].mxu1 %v3855_v6  ;;  %v1665_v6 = vld [vmem:[#allocation4 + $0xe8] sm:$0xff] }
 0x1e6   :  { %3145 = vmatpush3.bf16.msra.mxu1 %v3142_v45  ;;  %2828 = vmatprep.mubr.f32.mxu1 %v3882_v42  ;;  %v1666_v42 = vld [vmem:[#allocation4 + $0xf0] sm:$0xff]  ;;  %v1639_v45 = vld [vmem:[#allocation4 + $0x18] sm:$0xff] }
 0x1e7   :  { %3147 = vmatprep.subr.bf16.mxu1 %v3146_v62 }
 0x1e9   :  { %2829 = vmatmul.mubr.f32.gmra.mrb[28].mxu1 %v3879_v38 }
 0x1ea   :  { %3149 = vmatpush3.bf16.msra.mxu1 %v3146_v62  ;;  %2831 = vmatprep.mubr.f32.mxu1 %v3905_v1  ;;  %v1636_v1 = vld [vmem:[#allocation4] sm:$0xff] }
 0x1eb   :  { %3151 = vmatprep.subr.bf16.mxu1 %v3150_v26  ;;  %v3993_v4 = vpack.c.bf16 %v1637_v3, %v1636_v1 }
 0x1ed   :  { %2832 = vmatmul.mubr.f32.gmra.mrb[30].mxu1 %v3903_v18  ;;  %v1675_v18 = vld [vmem:[#allocation4 + $0x138] sm:$0xff] }
 0x1ee   :  { %3153 = vmatpush3.bf16.msra.mxu1 %v3150_v26  ;;  %2866 = vmatprep.mubr.f32.mxu1 %v3774_v53  ;;  %v1662_v53 = vld [vmem:[#allocation4 + $0xd0] sm:$0xff] }
 0x1ef   :  { %3250 = vmatprep.subr.bf16.mxu1 %v3960_v49 }
 0x1f1   :  { %2867 = vmatmul.mubr.f32.vlgmr.msra.gmra.mrb[16].mxu1 %v3796_v7  ;;  %v1663_v7 = vld [vmem:[#allocation4 + $0xd8] sm:$0xff] }
 0x1f2   :  { %2869 = vmatprep.mubr.f32.mxu1 %v3800_v9  ;;  %3258 = vmatpush3.bf16.msra.mxu1 %v3960_v49  ;;  %v1670_v9 = vld [vmem:[#allocation4 + $0x110] sm:$0xff] }
 0x1f5   :  { %2870 = vmatmul.mubr.f32.gmra.mrb[18].mxu1 %v3821_v39  ;;  %v3174_v39 = vpack.c.bf16 %v1663_v7, %v1662_v53  ;;  %v3190_v7 = vpack.c.bf16 %v1639_v45, %v1638_v23 }
 0x1f6   :  { %2872 = vmatprep.mubr.f32.mxu1 %v3825_v15  ;;  %v1671_v15 = vld [vmem:[#allocation4 + $0x118] sm:$0xff] }
 0x1f7   :  { %3175 = vmatprep.subr.bf16.mxu0 %v3174_v39 }
 0x1f8   :  { %3177 = vmatpush3.bf16.msra.mxu0 %v3174_v39 }
 0x1f9   :  { %2873 = vmatmul.mubr.f32.gmra.mrb[20].mxu1 %v3845_v63  ;;  %v3981_v63 = vpack.c.bf16 %v1671_v15, %v1670_v9 }
 0x1fa   :  { %2875 = vmatprep.mubr.f32.mxu1 %v3849_v20  ;;  %v1664_v20 = vld [vmem:[#allocation4 + $0xe0] sm:$0xff] }
 0x1fb   :  { %3251 = vmatprep.subr.bf16.mxu1 %v3981_v63 }
 0x1fc   :  { %3259 = vmatpush3.bf16.msra.mxu1 %v3981_v63 }
 0x1fd   :  { %2876 = vmatmul.mubr.f32.gmra.mrb[22].mxu1 %v3869_v30  ;;  %v3178_v30 = vpack.c.bf16 %v1665_v6, %v1664_v20  ;;  %v1640_v6 = vld [vmem:[#allocation4 + $0x20] sm:$0xff] }
 0x1fe   :  { %2878 = vmatprep.mubr.f32.mxu1 %v3873_v22  ;;  %v1673_v22 = vld [vmem:[#allocation4 + $0x128] sm:$0xff] }
 0x1ff   :  { %v3985_v38 = vpack.c.bf16 %v1673_v22, %v1672_v13  ;;  %3179 = vmatprep.subr.bf16.mxu0 %v3178_v30  ;;  %v1641_v13 = vld [vmem:[#allocation4 + $0x28] sm:$0xff] }
 0x200   :  { %3181 = vmatpush3.bf16.msra.mxu0 %v3178_v30 }
 0x201   :  { %2879 = vmatmul.mubr.f32.gmra.mrb[24].mxu1 %v3893_v57  ;;  %3252 = vmatprep.subr.bf16.mxu1 %v3985_v38  ;;  %v1667_v57 = vld [vmem:[#allocation4 + $0xf8] sm:$0xff] }
 0x202   :  { %2881 = vmatprep.mubr.f32.mxu1 %v3897_v27  ;;  %v1674_v27 = vld [vmem:[#allocation4 + $0x130] sm:$0xff]  ;;  %3260 = vmatpush3.bf16.msra.mxu1 %v3985_v38  ;;  %v3182_v61 = vpack.c.bf16 %v1667_v57, %v1666_v42 }
 0x203   :  { %v3989_v0 = vpack.c.bf16 %v1675_v18, %v1674_v27 }
 0x204   :  { %3183 = vmatprep.subr.bf16.mxu0 %v3182_v61 }
 0x205   :  { %2882 = vmatmul.mubr.f32.gmra.mrb[26].mxu1 %v3913_v8  ;;  %3185 = vmatpush3.bf16.msra.mxu0 %v3182_v61  ;;  %v3995_v8 = vpack.c.bf16 %v1677_v5, %v1676_v24  ;;  %v3194_v5 = vpack.c.bf16 %v1641_v13, %v1640_v6 }
 0x206   :  { %2884 = vmatprep.mubr.f32.mxu1 %v3918_v11  ;;  %3253 = vmatprep.subr.bf16.mxu1 %v3989_v0  ;;  %v1679_v11 = vld [vmem:[#allocation4 + $0x158] sm:$0xff] }
 0x207   :  { %3261 = vmatpush3.bf16.msra.mxu1 %v3989_v0  ;;  %3187 = vmatprep.subr.bf16.mxu0 %v3993_v4  ;;  %v4000_v16 = vpack.c.bf16 %v1679_v11, %v1678_v10 }
 0x208   :  { %3254 = vmatprep.subr.bf16.mxu1 %v3995_v8 }
 0x209   :  { %2885 = vmatmul.mubr.f32.gmra.mrb[28].mxu1 %v3939_v35 }
 0x20a   :  { %2887 = vmatprep.mubr.f32.mxu1 %v3943_v43 }
 0x20b   :  { %3262 = vmatpush3.bf16.msra.mxu1 %v3995_v8 }
 0x20c   :  { %3255 = vmatprep.subr.bf16.mxu1 %v4000_v16 }
 0x20d   :  { %2888 = vmatmul.mubr.f32.gmra.mrb[30].mxu1 %v3931_v29  ;;  %v1683_v29 = vld [vmem:[#allocation4 + $0x178] sm:$0xff] }
 0x20e   :  { %v4008_v21 = vpack.c.bf16 %v1683_v29, %v1682_v28  ;;  %v1642_v28 = vld [vmem:[#allocation4 + $0x30] sm:$0xff]  ;;  %v1643_v29 = vld [vmem:[#allocation4 + $0x38] sm:$0xff] }
 0x20f   :  { %3263 = vmatpush3.bf16.msra.mxu1 %v4000_v16 }
 0x210   :  { %3256 = vmatprep.subr.bf16.mxu1 %v4004_v25 }
 0x213   :  { %3264 = vmatpush3.bf16.msra.mxu1 %v4004_v25 }
 0x214   :  { %3257 = vmatprep.subr.bf16.mxu1 %v4008_v21 }
 0x217   :  { %3265 = vmatpush3.bf16.msra.mxu1 %v4008_v21 }
 0x2c4   :  { %v2868_v56 = vpop.f32.mrb[16].mxu1 }
 0x2c5   :  { %v1605_v34 = vadd.f32 %v2868_v56, %v4015_v32  ;;  %v1503_v35 = vpop.f32.mrb[17].mxu1 }
 0x2c6   :  { %v1604_v43 = vadd.f32 %v4015_v32, %v1503_v35 }
 0x2c7   :  { %v4019_v44 = vmax.f32 %v1605_v34, 0.0 }
 0x2c8   :  { %v4021_v37 = vmax.f32 %v1604_v43, 0.0  ;;  %v2871_v12 = vpop.f32.mrb[18].mxu1 }
 0x2c9   :  { %v1686_v40 = vrot.slane %v4019_v44, 1  ;;  %v1718_v41 = vrot.slane %v4019_v44, 2  ;;  %v1607_v46 = vadd.f32 %v2871_v12, %v4015_v32  ;;  %v1513_v47 = vpop.f32.mrb[19].mxu1 }
 0x2ca   :  { %v1685_v50 = vrot.slane %v4021_v37, 1  ;;  %v1717_v51 = vrot.slane %v4021_v37, 2  ;;  %v1606_v36 = vadd.f32 %v4015_v32, %v1513_v47 }
 0x2cb   :  { %v4029_v52 = vmax.f32 %v1607_v46, 0.0 }
 0x2cc   :  { %v4031_v55 = vmax.f32 %v1606_v36, 0.0  ;;  %v2874_v33 = vpop.f32.mrb[20].mxu1  ;;  %v1715_v48 = vsel %vm340_vm2, %v1685_v50, %v1686_v40  ;;  %v4041_v2 = vsel %vm373_vm3, %v1717_v51, %v1718_v41  ;;  %v3198_v36 = vpack.c.bf16 %v1643_v29, %v1642_v28 }
 0x2cd   :  { %v1688_v58 = vrot.slane %v4029_v52, 1  ;;  %v1720_v62 = vrot.slane %v4029_v52, 2  ;;  %v1609_v31 = vadd.f32 %v2874_v33, %v4015_v32  ;;  %v1523_v59 = vpop.f32.mrb[21].mxu1  ;;  %2922 = vmatprep.mubr.f32.mxu0 %v1715_v48 }
 0x2ce   :  { %v1687_v26 = vrot.slane %v4031_v55, 1  ;;  %v1719_v54 = vrot.slane %v4031_v55, 2  ;;  %v1608_v60 = vadd.f32 %v4015_v32, %v1523_v59 }
 0x2cf   :  { %v4049_v53 = vmax.f32 %v1609_v31, 0.0 }
 0x2d0   :  { %v4051_v9 = vmax.f32 %v1608_v60, 0.0  ;;  %v2877_v39 = vpop.f32.mrb[22].mxu1  ;;  %v1714_v15 = vsel %vm340_vm2, %v1686_v40, %v1687_v26  ;;  %v1713_v20 = vsel %vm340_vm2, %v1687_v26, %v1688_v58  ;;  %v4059_v30 = vsel %vm373_vm3, %v1718_v41, %v1719_v54 }
 0x2d1   :  { %v1690_v22 = vrot.slane %v4049_v53, 1  ;;  %v1722_v42 = vrot.slane %v4049_v53, 2  ;;  %v1611_v57 = vadd.f32 %v2877_v39, %v4015_v32  ;;  %v1533_v27 = vpop.f32.mrb[23].mxu1  ;;  %2923 = vmatmul.mubr.f32.vlgmr.msra.gmra.mrb[16].mxu0 %v1714_v15  ;;  %v4066_v61 = vsel %vm373_vm3, %v1719_v54, %v1720_v62 }
 0x2d2   :  { %v1689_v18 = vrot.slane %v4051_v9, 1  ;;  %v1721_v1 = vrot.slane %v4051_v9, 2  ;;  %v1610_v3 = vadd.f32 %v4015_v32, %v1533_v27  ;;  %3189 = vmatpush3.bf16.msra.mxu0 %v3993_v4  ;;  %2925 = vmatprep.mubr.f32.mxu0 %v1713_v20 }
 0x2d3   :  { %v4072_v24 = vmax.f32 %v1611_v57, 0.0  ;;  %3191 = vmatprep.subr.bf16.mxu0 %v3190_v7 }
 0x2d4   :  { %v4074_v10 = vmax.f32 %v1610_v3, 0.0  ;;  %v2880_v11 = vpop.f32.mrb[24].mxu1  ;;  %v1712_v17 = vsel %vm340_vm2, %v1688_v58, %v1689_v18  ;;  %v1711_v19 = vsel %vm340_vm2, %v1689_v18, %v1690_v22  ;;  %v4082_v56 = vsel %vm373_vm3, %v1720_v62, %v1721_v1  ;;  %v1644_v58 = vld [vmem:[#allocation4 + $0x40] sm:$0xff]  ;;  %v1645_v62 = vld [vmem:[#allocation4 + $0x48] sm:$0xff]  ;;  %v1647_v3 = vld [vmem:[#allocation4 + $0x58] sm:$0xff] }
 0x2d5   :  { %v1692_v4 = vrot.slane %v4072_v24, 1  ;;  %v1724_v34 = vrot.slane %v4072_v24, 2  ;;  %v1613_v35 = vadd.f32 %v2880_v11, %v4015_v32  ;;  %v1543_v43 = vpop.f32.mrb[25].mxu1  ;;  %2926 = vmatmul.mubr.f32.gmra.mrb[18].mxu0 %v1712_v17  ;;  %v4089_v12 = vsel %vm373_vm3, %v1721_v1, %v1722_v42  ;;  %v1646_v1 = vld [vmem:[#allocation4 + $0x50] sm:$0xff] }
 0x2d6   :  { %v1691_v40 = vrot.slane %v4074_v10, 1  ;;  %v1723_v41 = vrot.slane %v4074_v10, 2  ;;  %v1612_v46 = vadd.f32 %v4015_v32, %v1543_v43  ;;  %3193 = vmatpush3.bf16.msra.mxu0 %v3190_v7  ;;  %2928 = vmatprep.mubr.f32.mxu0 %v1711_v19  ;;  %v3202_v13 = vpack.c.bf16 %v1645_v62, %v1644_v58  ;;  %v1649_v58 = vld [vmem:[#allocation4 + $0x68] sm:$0xff] }
 0x2d7   :  { %v4094_v47 = vmax.f32 %v1613_v35, 0.0  ;;  %3195 = vmatprep.subr.bf16.mxu0 %v3194_v5 }
 0x2d8   :  { %v4096_v33 = vmax.f32 %v1612_v46, 0.0  ;;  %v2883_v48 = vpop.f32.mrb[26].mxu1  ;;  %v1710_v23 = vsel %vm340_vm2, %v1690_v22, %v1691_v40  ;;  %v1709_v45 = vsel %vm340_vm2, %v1691_v40, %v1692_v4  ;;  %v4104_v31 = vsel %vm373_vm3, %v1722_v42, %v1723_v41 }
 0x2d9   :  { %v1694_v59 = vrot.slane %v4094_v47, 1  ;;  %v1726_v26 = vrot.slane %v4094_v47, 2  ;;  %v1615_v54 = vadd.f32 %v2883_v48, %v4015_v32  ;;  %v1553_v60 = vpop.f32.mrb[27].mxu1  ;;  %2929 = vmatmul.mubr.f32.gmra.mrb[20].mxu0 %v1710_v23  ;;  %v4111_v7 = vsel %vm373_vm3, %v1723_v41, %v1724_v34 }
 0x2da   :  { %v1693_v39 = vrot.slane %v4096_v33, 1  ;;  %v1725_v15 = vrot.slane %v4096_v33, 2  ;;  %v1614_v20 = vadd.f32 %v4015_v32, %v1553_v60  ;;  %3197 = vmatpush3.bf16.msra.mxu0 %v3194_v5  ;;  %2931 = vmatprep.mubr.f32.mxu0 %v1709_v45  ;;  %v3206_v40 = vpack.c.bf16 %v1647_v3, %v1646_v1  ;;  %v1648_v45 = vld [vmem:[#allocation4 + $0x60] sm:$0xff]  ;;  %v1650_v3 = vld [vmem:[#allocation4 + $0x70] sm:$0xff] }
 0x2db   :  { %v4116_v6 = vmax.f32 %v1615_v54, 0.0  ;;  %3199 = vmatprep.subr.bf16.mxu0 %v3198_v36 }
 0x2dc   :  { %v4118_v22 = vmax.f32 %v1614_v20, 0.0  ;;  %v2886_v42 = vpop.f32.mrb[28].mxu1  ;;  %v1708_v57 = vsel %vm340_vm2, %v1692_v4, %v1693_v39  ;;  %v1739_v27 = vsel %vm373_vm3, %v1725_v15, %v1726_v26  ;;  %v1707_v18 = vsel %vm340_vm2, %v1693_v39, %v1694_v59 }
 0x2dd   :  { %v1696_v5 = vrot.slane %v4116_v6, 1  ;;  %v1728_v11 = vrot.slane %v4116_v6, 2  ;;  %v1617_v17 = vadd.f32 %v2886_v42, %v4015_v32  ;;  %v1563_v19 = vpop.f32.mrb[29].mxu1  ;;  %2932 = vmatmul.mubr.f32.gmra.mrb[22].mxu0 %v1708_v57  ;;  %3046 = vmatprep.mubr.f32.mxu1 %v1739_v27  ;;  %v4131_v28 = vsel %vm373_vm3, %v1724_v34, %v1725_v15 }
 0x2de   :  { %v1695_v29 = vrot.slane %v4118_v22, 1  ;;  %v1727_v4 = vrot.slane %v4118_v22, 2  ;;  %v1616_v35 = vadd.f32 %v4015_v32, %v1563_v19  ;;  %3201 = vmatpush3.bf16.msra.mxu0 %v3198_v36  ;;  %2934 = vmatprep.mubr.f32.mxu0 %v1707_v18  ;;  %v3210_v42 = vpack.c.bf16 %v1649_v58, %v1648_v45 }
 0x2df   :  { %v4136_v43 = vmax.f32 %v1617_v17, 0.0  ;;  %3203 = vmatprep.subr.bf16.mxu0 %v3202_v13  ;;  %v1651_v17 = vld [vmem:[#allocation4 + $0x78] sm:$0xff] }
 0x2e0   :  { %v4138_v41 = vmax.f32 %v1616_v35, 0.0  ;;  %v2889_v46 = vpop.f32.mrb[30].mxu1  ;;  %v1706_v48 = vsel %vm340_vm2, %v1694_v59, %v1695_v29  ;;  %v1738_v34 = vsel %vm373_vm3, %v1726_v26, %v1727_v4  ;;  %v1705_v23 = vsel %vm340_vm2, %v1695_v29, %v1696_v5 }
 0x2e1   :  { %v1698_v36 = vrot.slane %v4136_v43, 1  ;;  %v1730_v62 = vrot.slane %v4136_v43, 2  ;;  %v1619_v54 = vadd.f32 %v2889_v46, %v4015_v32  ;;  %v1573_v60 = vpop.f32.mrb[31].mxu1  ;;  %2935 = vmatmul.mubr.f32.gmra.mrb[24].mxu0 %v1706_v48  ;;  %3047 = vmatmul.mubr.f32.vlgmr.msra.gmra.mrb[32].mxu1 %v1738_v34  ;;  %v1737_v59 = vsel %vm373_vm3, %v1727_v4, %v1728_v11 }
 0x2e2   :  { %v1697_v39 = vrot.slane %v4138_v41, 1  ;;  %v1729_v26 = vrot.slane %v4138_v41, 2  ;;  %v1618_v15 = vadd.f32 %v4015_v32, %v1573_v60  ;;  %3205 = vmatpush3.bf16.msra.mxu0 %v3202_v13  ;;  %2937 = vmatprep.mubr.f32.mxu0 %v1705_v23 }
 0x2e3   :  { %v4154_v20 = vmax.f32 %v1619_v54, 0.0  ;;  %3049 = vmatprep.mubr.f32.mxu1 %v1737_v59  ;;  %3207 = vmatprep.subr.bf16.mxu0 %v3206_v40 }
 0x2e4   :  { %v1634_v57 = vmax.f32 %v1618_v15, 0.0  ;;  %v1704_v27 = vsel %vm340_vm2, %v1696_v5, %v1697_v39  ;;  %v1736_v18 = vsel %vm373_vm3, %v1728_v11, %v1729_v26  ;;  %v1703_v1 = vsel %vm340_vm2, %v1697_v39, %v1698_v36 }
 0x2e5   :  { %v1700_v32 = vrot.slane %v4154_v20, 1  ;;  %v1732_v13 = vrot.slane %v4154_v20, 2  ;;  %2938 = vmatmul.mubr.f32.gmra.mrb[26].mxu0 %v1704_v27  ;;  %3050 = vmatmul.mubr.f32.gmra.mrb[34].mxu1 %v1736_v18  ;;  %v1735_v19 = vsel %vm373_vm3, %v1729_v26, %v1730_v62  ;;  %v3214_v5 = vpack.c.bf16 %v1651_v17, %v1650_v3 }
 0x2e6   :  { %v1699_v29 = vrot.slane %v1634_v57, 1  ;;  %v1731_v4 = vrot.slane %v1634_v57, 2  ;;  %3209 = vmatpush3.bf16.msra.mxu0 %v3206_v40  ;;  %2940 = vmatprep.mubr.f32.mxu0 %v1703_v1 }
 0x2e7   :  { %3052 = vmatprep.mubr.f32.mxu1 %v1735_v19  ;;  %3211 = vmatprep.subr.bf16.mxu0 %v3210_v42  ;;  %v1716_v11 = vsel %vm340_vm2, %v1700_v32, %v1685_v50  ;;  %v1748_v35 = vsel %vm373_vm3, %v1732_v13, %v1717_v51  ;;  %v4227_v50 = vadd.s32 8, %v3525_v14 }
 0x2e8   :  { %v1702_v46 = vsel %vm340_vm2, %v1698_v36, %v1699_v29  ;;  %v1734_v40 = vsel %vm373_vm3, %v1730_v62, %v1731_v4  ;;  %v1701_v48 = vsel %vm340_vm2, %v1699_v29, %v1700_v32  ;;  %v1733_v34 = vsel %vm373_vm3, %v1731_v4, %v1732_v13 }
 0x2e9   :  { %2941 = vmatmul.mubr.f32.gmra.mrb[28].mxu0 %v1702_v46  ;;  %3053 = vmatmul.mubr.f32.gmra.mrb[36].mxu1 %v1734_v40  ;;  %vm2240_vm4 = vcmp.lt.s32.totalorder %v4227_v50, 10 }
 0x2ea   :  { %3213 = vmatpush3.bf16.msra.mxu0 %v3210_v42  ;;  %2943 = vmatprep.mubr.f32.mxu0 %v1701_v48 }
 0x2eb   :  { %3055 = vmatprep.mubr.f32.mxu1 %v1733_v34  ;;  %3215 = vmatprep.subr.bf16.mxu0 %v3214_v5 }
 0x2ed   :  { %2944 = vmatmul.mubr.f32.gmra.mrb[30].mxu0 %v1716_v11  ;;  %3056 = vmatmul.mubr.f32.gmra.mrb[38].mxu1 %v1748_v35 }
 0x2ee   :  { %3217 = vmatpush3.bf16.msra.mxu0 %v3214_v5  ;;  %2978 = vmatprep.mubr.f32.mxu0 %v4021_v37 }
 0x2ef   :  { %3219 = vmatprep.subr.bf16.mxu0 %v3960_v49 }
 0x2f1   :  { %2979 = vmatmul.mubr.f32.vlgmr.msra.gmra.mrb[16].mxu0 %v4019_v44  ;;  %v4224_v44 = vld [vmem:[%s4275_s6] ss:$0 sm:$0xff] }
 0x2f2   :  { %3221 = vmatpush3.bf16.msra.mxu0 %v3960_v49  ;;  %2981 = vmatprep.mubr.f32.mxu0 %v4031_v55 }
 0x2f3   :  { %3223 = vmatprep.subr.bf16.mxu0 %v3981_v63 }
 0x2f5   :  { %2982 = vmatmul.mubr.f32.gmra.mrb[18].mxu0 %v4029_v52 }
 0x2f6   :  { %3225 = vmatpush3.bf16.msra.mxu0 %v3981_v63  ;;  %2984 = vmatprep.mubr.f32.mxu0 %v4051_v9 }
 0x2f7   :  { %3227 = vmatprep.subr.bf16.mxu0 %v3985_v38 }
 0x2f9   :  { %2985 = vmatmul.mubr.f32.gmra.mrb[20].mxu0 %v4049_v53 }
 0x2fa   :  { %3229 = vmatpush3.bf16.msra.mxu0 %v3985_v38  ;;  %2987 = vmatprep.mubr.f32.mxu0 %v4074_v10 }
 0x2fb   :  { %3231 = vmatprep.subr.bf16.mxu0 %v3989_v0 }
 0x2fd   :  { %2988 = vmatmul.mubr.f32.gmra.mrb[22].mxu0 %v4072_v24 }
 0x2fe   :  { %3233 = vmatpush3.bf16.msra.mxu0 %v3989_v0  ;;  %2990 = vmatprep.mubr.f32.mxu0 %v4096_v33 }
 0x2ff   :  { %3235 = vmatprep.subr.bf16.mxu0 %v3995_v8 }
 0x301   :  { %2991 = vmatmul.mubr.f32.gmra.mrb[24].mxu0 %v4094_v47 }
 0x302   :  { %3237 = vmatpush3.bf16.msra.mxu0 %v3995_v8  ;;  %2993 = vmatprep.mubr.f32.mxu0 %v4118_v22 }
 0x303   :  { %3239 = vmatprep.subr.bf16.mxu0 %v4000_v16 }
 0x305   :  { %2994 = vmatmul.mubr.f32.gmra.mrb[26].mxu0 %v4116_v6 }
 0x306   :  { %3241 = vmatpush3.bf16.msra.mxu0 %v4000_v16  ;;  %2996 = vmatprep.mubr.f32.mxu0 %v4138_v41 }
 0x307   :  { %3243 = vmatprep.subr.bf16.mxu0 %v4004_v25 }
 0x309   :  { %2997 = vmatmul.mubr.f32.gmra.mrb[28].mxu0 %v4136_v43 }
 0x30a   :  { %3245 = vmatpush3.bf16.msra.mxu0 %v4004_v25  ;;  %2999 = vmatprep.mubr.f32.mxu0 %v1634_v57 }
 0x30b   :  { %3247 = vmatprep.subr.bf16.mxu0 %v4008_v21 }
 0x30d   :  { %3000 = vmatmul.mubr.f32.gmra.mrb[30].mxu0 %v4154_v20 }
 0x30e   :  { %3249 = vmatpush3.bf16.msra.mxu0 %v4008_v21  ;;  %3034 = vmatprep.mubr.f32.mxu0 %v4041_v2 }
 0x311   :  { %3035 = vmatmul.mubr.f32.vlgmr.msra.gmra.mrb[16].mxu0 %v4059_v30 }
 0x312   :  { %3037 = vmatprep.mubr.f32.mxu0 %v4066_v61 }
 0x315   :  { %3038 = vmatmul.mubr.f32.gmra.mrb[18].mxu0 %v4082_v56 }
 0x316   :  { %3040 = vmatprep.mubr.f32.mxu0 %v4089_v12 }
 0x319   :  { %3041 = vmatmul.mubr.f32.gmra.mrb[20].mxu0 %v4104_v31 }
 0x31a   :  { %3043 = vmatprep.mubr.f32.mxu0 %v4111_v7 }
 0x31d   :  { %3044 = vmatmul.mubr.f32.gmra.mrb[22].mxu0 %v4131_v28 }
 0x3b4   :  { %v3048_v49 = vpop.f32.mrb[32].mxu1 }
 0x3b5   :  { %v2145_v63 = vpop.f32.mrb[33].mxu1 }
 0x3b8   :  { %v3051_v38 = vpop.f32.mrb[34].mxu1 }
 0x3b9   :  { %v2155_v0 = vpop.f32.mrb[35].mxu1 }
 0x3bc   :  { %v3054_v8 = vpop.f32.mrb[36].mxu1 }
 0x3bd   :  { %v2165_v16 = vpop.f32.mrb[37].mxu1 }
 0x3c0   :  { %v3057_v25 = vpop.f32.mrb[38].mxu1 }
 0x3c1   :  { %v2175_v21 = vpop.f32.mrb[39].mxu1 }
 0x3d4   :  { %v2992_v37 = vpop.f32.mrb[24].mxu0 }
 0x3d5   :  { %v3282_v51 = vadd.f32 %v3048_v49, %v2992_v37  ;;  %v2000_v52 = vpop.f32.mrb[25].mxu0 }
 0x3d6   :  { %v3283_v55 = vadd.f32 %v2145_v63, %v2000_v52 }
 0x3d7   :  { %v2215_v2 = vadd.f32 %v3282_v51, %v4224_v44 }
 0x3d8   :  { %v2214_v53 = vadd.f32 %v3283_v55, %v4224_v44  ;;  %v2995_v9 = vpop.f32.mrb[26].mxu0 }
 0x3d9   :  { %v2231_v30 = vmax.f32 %v2215_v2, 0.0  ;;  %v3284_v61 = vadd.f32 %v3051_v38, %v2995_v9  ;;  %v2010_v24 = vpop.f32.mrb[27].mxu0 }
 0x3da   :  { %v2230_v10 = vmax.f32 %v2214_v53, 0.0  ;;  %v3285_v56 = vadd.f32 %v2155_v0, %v2010_v24 }
 0x3db   :  { %v2254_v12 = vsel %vm2240_vm4, %v2231_v30, 0.0  ;;  %v2217_v14 = vadd.f32 %v3284_v61, %v4224_v44 }
 0x3dc   :  { %v4235_v47 = vmax.f32 %v2230_v10, %v2254_v12  ;;  %v2216_v33 = vadd.f32 %v3285_v56, %v4224_v44  ;;  %v2998_v31 = vpop.f32.mrb[28].mxu0 }
 0x3dd   :  { %v2233_v7 = vmax.f32 %v2217_v14, 0.0  ;;  %v3286_v6 = vadd.f32 %v3054_v8, %v2998_v31  ;;  %v2020_v22 = vpop.f32.mrb[29].mxu0 }
 0x3de   :  { %v2232_v28 = vmax.f32 %v2216_v33, 0.0  ;;  %v3287_v43 = vadd.f32 %v2165_v16, %v2020_v22 }
 0x3df   :  { %v2256_v41 = vsel %vm2240_vm4, %v2233_v7, 0.0  ;;  %v2219_v23 = vadd.f32 %v3286_v6, %v4224_v44 }
 0x3e0   :  { %v2296_v45 = vmax.f32 %v2232_v28, %v2256_v41  ;;  %v2218_v58 = vadd.f32 %v3287_v43, %v4224_v44  ;;  %v3001_v36 = vpop.f32.mrb[30].mxu0 }
 0x3e1   :  { %v2235_v62 = vmax.f32 %v2219_v23, 0.0  ;;  %v3288_v54 = vadd.f32 %v3057_v25, %v3001_v36  ;;  %v2030_v60 = vpop.f32.mrb[31].mxu0 }
 0x3e2   :  { %v2234_v59 = vmax.f32 %v2218_v58, 0.0  ;;  %v3289_v39 = vadd.f32 %v2175_v21, %v2030_v60  ;;  %v2290_v21 = vrot.slane %v4235_v47, 4  ;;  %v2297_v52 = vrot.slane %v2296_v45, 4 }
 0x3e3   :  { %v2258_v26 = vsel %vm2240_vm4, %v2235_v62, 0.0  ;;  %v2221_v15 = vadd.f32 %v3288_v54, %v4224_v44 }
 0x3e4   :  { %v2303_v20 = vmax.f32 %v2234_v59, %v2258_v26  ;;  %v2220_v42 = vadd.f32 %v3289_v39, %v4224_v44  ;;  %v3036_v57 = vpop.f32.mrb[16].mxu0  ;;  %v2291_v31 = vmax.f32 %v4235_v47, %v2290_v21  ;;  %v2298_v22 = vmax.f32 %v2296_v45, %v2297_v52 }
 0x3e5   :  { %v2237_v27 = vmax.f32 %v2221_v15, 0.0  ;;  %v2207_v18 = vadd.f32 %v3036_v57, %v4224_v44  ;;  %v2105_v1 = vpop.f32.mrb[17].mxu0 }
 0x3e6   :  { %v2236_v3 = vmax.f32 %v2220_v42, 0.0  ;;  %v2206_v13 = vadd.f32 %v4224_v44, %v2105_v1  ;;  %v2304_v55 = vrot.slane %v2303_v20, 4  ;;  %v2292_v39 = vrot.slane %v2291_v31, 2 }
 0x3e7   :  { %v2260_v17 = vsel %vm2240_vm4, %v2237_v27, 0.0  ;;  %v2223_v32 = vmax.f32 %v2207_v18, 0.0  ;;  %v2299_v26 = vrot.slane %v2298_v22, 2 }
 0x3e8   :  { %v2310_v19 = vmax.f32 %v2236_v3, %v2260_v17  ;;  %v3039_v29 = vpop.f32.mrb[18].mxu0  ;;  %v2222_v5 = vmax.f32 %v2206_v13, 0.0  ;;  %v2305_v23 = vmax.f32 %v2303_v20, %v2304_v55  ;;  %v2293_v1 = vmax.f32 %v2291_v31, %v2292_v39 }
 0x3e9   :  { %v2246_v4 = vsel %vm2240_vm4, %v2223_v32, 0.0  ;;  %v2209_v11 = vadd.f32 %v3039_v29, %v4224_v44  ;;  %v2115_v35 = vpop.f32.mrb[19].mxu0  ;;  %v2300_v3 = vmax.f32 %v2298_v22, %v2299_v26 }
 0x3ea   :  { %v2208_v46 = vadd.f32 %v4224_v44, %v2115_v35  ;;  %v2261_v40 = vmax.f32 %v2222_v5, %v2246_v4  ;;  %v2311_v30 = vrot.slane %v2310_v19, 4  ;;  %v2306_v42 = vrot.slane %v2305_v23, 2 }
 0x3eb   :  { %v2225_v48 = vmax.f32 %v2209_v11, 0.0  ;;  %v2294_v5 = vrot.slane %v2293_v1, 1  ;;  %v2301_v11 = vrot.slane %v2300_v3, 1 }
 0x3ec   :  { %v2224_v34 = vmax.f32 %v2208_v46, 0.0  ;;  %v3042_v49 = vpop.f32.mrb[20].mxu0  ;;  %v2262_v63 = vrot.slane %v2261_v40, 4  ;;  %v2312_v58 = vmax.f32 %v2310_v19, %v2311_v30  ;;  %v2307_v13 = vmax.f32 %v2305_v23, %v2306_v42 }
 0x3ed   :  { %v2248_v38 = vsel %vm2240_vm4, %v2225_v48, 0.0  ;;  %v2211_v0 = vadd.f32 %v3042_v49, %v4224_v44  ;;  %v2125_v8 = vpop.f32.mrb[21].mxu0  ;;  %v2295_v49 = vmax.f32 %v2293_v1, %v2294_v5 }
 0x3ee   :  { %v2268_v16 = vmax.f32 %v2224_v34, %v2248_v38  ;;  %v2210_v25 = vadd.f32 %v4224_v44, %v2125_v8  ;;  %v2263_v37 = vmax.f32 %v2261_v40, %v2262_v63  ;;  %v2313_v57 = vrot.slane %v2312_v58, 2 }
 0x3ef   :  { %v2227_v51 = vmax.f32 %v2211_v0, 0.0  ;;  %v2308_v40 = vrot.slane %v2307_v13, 1  ;;  %v2302_v63 = vmax.f32 %v2300_v3, %v2301_v11 }
 0x3f0   :  { %v2269_v2 = vrot.slane %v2268_v16, 4  ;;  %v2226_v53 = vmax.f32 %v2210_v25, 0.0  ;;  %v3045_v9 = vpop.f32.mrb[22].mxu0  ;;  %v2264_v61 = vrot.slane %v2263_v37, 2  ;;  %v2314_v19 = vmax.f32 %v2312_v58, %v2313_v57 }
 0x3f1   :  { %v2250_v24 = vsel %vm2240_vm4, %v2227_v51, 0.0  ;;  %v2213_v10 = vadd.f32 %v3045_v9, %v4224_v44  ;;  %v2135_v56 = vpop.f32.mrb[23].mxu0  ;;  %v2309_v0 = vmax.f32 %v2307_v13, %v2308_v40 }
 0x3f2   :  { %v2270_v12 = vmax.f32 %v2268_v16, %v2269_v2  ;;  %v2275_v14 = vmax.f32 %v2226_v53, %v2250_v24  ;;  %v2212_v33 = vadd.f32 %v4224_v44, %v2135_v56  ;;  %v2265_v7 = vmax.f32 %v2263_v37, %v2264_v61 }
 0x3f3   :  { %v2229_v6 = vmax.f32 %v2213_v10, 0.0  ;;  %v2315_v48 = vrot.slane %v2314_v19, 1 }
 0x3f4   :  { %v2271_v28 = vrot.slane %v2270_v12, 2  ;;  %v2276_v43 = vrot.slane %v2275_v14, 4  ;;  %v2228_v41 = vmax.f32 %v2212_v33, 0.0  ;;  %v2266_v62 = vrot.slane %v2265_v7, 1 }
 0x3f5   :  { %v2252_v36 = vsel %vm2240_vm4, %v2229_v6, 0.0  ;;  %v2316_v16 = vmax.f32 %v2314_v19, %v2315_v48 }
 0x3f6   :  { %v2272_v54 = vmax.f32 %v2270_v12, %v2271_v28  ;;  %v2277_v60 = vmax.f32 %v2275_v14, %v2276_v43  ;;  %v2282_v59 = vmax.f32 %v2228_v41, %v2252_v36  ;;  %v2267_v45 = vmax.f32 %v2265_v7, %v2266_v62 }
 0x3f8   :  { %v2273_v44 = vrot.slane %v2272_v54, 1  ;;  %v2278_v15 = vrot.slane %v2277_v60, 2  ;;  %v2283_v47 = vrot.slane %v2282_v59, 4 }
 0x3fa   :  { %v2274_v27 = vmax.f32 %v2272_v54, %v2273_v44  ;;  %v2279_v18 = vmax.f32 %v2277_v60, %v2278_v15  ;;  %v2284_v20 = vmax.f32 %v2282_v59, %v2283_v47 }
 0x3fc   :  { %v2326_v50 = vsel %vm2325_vm5, %v2274_v27, %v2267_v45  ;;  %v2280_v17 = vrot.slane %v2279_v18, 1  ;;  %v2285_v32 = vrot.slane %v2284_v20, 2 }
 0x3fe   :  { %v2281_v29 = vmax.f32 %v2279_v18, %v2280_v17  ;;  %v2286_v4 = vmax.f32 %v2284_v20, %v2285_v32 }
 0x400   :  { %v2328_v35 = vsel %vm2327_vm6, %v2281_v29, %v2326_v50  ;;  %v2287_v46 = vrot.slane %v2286_v4, 1 }
 0x402   :  { %v2288_v34 = vmax.f32 %v2286_v4, %v2287_v46 }
 0x404   :  { %v2330_v38 = vsel %vm2329_vm7, %v2288_v34, %v2328_v35 }
 0x405   :  { %v2332_v8 = vsel %vm2331_vm8, %v2295_v49, %v2330_v38 }
 0x406   :  { %v2334_v25 = vsel %vm2333_vm9, %v2302_v63, %v2332_v8 }
 0x407   :  { %v2336_v21 = vsel %vm2335_vm10, %v2309_v0, %v2334_v25 }
 0x408   :  { %v2338_v37 = vsel %vm2337_vm11, %v2316_v16, %v2336_v21 }
 0x409   :  { %2340 = vst [vmem:[%s4276_s7] sm:$0xff] %v2338_v37 }
 0x40a   :  { %2345 = vsyncpa [#allocation3], 1 }
 0x40b   :  { %2346 = vsyncpa [#allocation5], 1 }

</bundles_post_ra>
